<compile_context>
chip_gen: v6e
topology: v6e:2x2x1
jax: 0.10.0
libtpu: 0.0.40
codegen_flags: <defaults>
</compile_context>

<pallas_src>
import math
import functools

import jax
import jax.numpy as jnp
import numpy as np
from jax.experimental import pallas as pl
from jax.experimental.pallas import tpu as pltpu


# ----------------------------------------------------------------------------
# Helpers
# ----------------------------------------------------------------------------
def _layernorm(x, w, b, eps=1e-5):
    # PyTorch nn.LayerNorm: biased variance over last dim, eps inside sqrt.
    mean = jnp.mean(x, axis=-1, keepdims=True)
    var = jnp.mean(jnp.square(x - mean), axis=-1, keepdims=True)
    return (x - mean) * jax.lax.rsqrt(var + eps) * w + b


def _vmem_capacity_bytes():
    try:
        info = pltpu.get_tpu_info()
        cap = getattr(info, "vmem_capacity_bytes", None)
        if cap:
            return int(cap)
    except Exception:
        pass
    return 64 * 1024 * 1024  # conservative fallback (v7x physical VMEM)


def _vmem_budget(resident_bytes):
    # ~2x headroom over the estimated resident footprint, floor 32 MiB,
    # ceiling ~85% of physical VMEM (≈54 MiB on v7x, ≈108 MiB on v5e/v6e).
    cap = _vmem_capacity_bytes()
    return int(min(max(2 * resident_bytes, 32 * 1024 * 1024),
                   int(0.85 * cap)))


# ----------------------------------------------------------------------------
# Fused transformer-stack kernel: grid=(L,), activation (B*S, D) resident in
# VMEM scratch across layers, per-layer weights streamed (double-buffered).
# ----------------------------------------------------------------------------
def fused_blocks_kernel(num_heads, seq_len,
                        x_ref,                      # (BS, D)  f32 input
                        in_w_ref, in_b_ref,         # (D, 3D) bf16, (1, 3D) f32
                        out_w_ref, out_b_ref,       # (D, D) bf16, (1, D) f32
                        ln1_w_ref, ln1_b_ref,       # (1, D) f32
                        ffn1_w_ref, ffn1_b_ref,     # (D, F) bf16, (1, F) f32
                        ffn2_w_ref, ffn2_b_ref,     # (F, D) bf16, (1, D) f32
                        ln2_w_ref, ln2_b_ref,       # (1, D) f32
                        lnf_w_ref, lnf_b_ref,       # (1, D) f32 (constant)
                        o_ref,                      # (BS, D)  bf16 ln_f output
                        x_scratch,                  # VMEM (BS, D) f32
                        ctx_scratch):               # VMEM (BS, D) f32
    l = pl.program_id(0)

    @pl.when(l == 0)
    def _():
        x_scratch[...] = x_ref[...]

    x = x_scratch[...]                              # (BS, D) f32
    BS, D = x.shape
    S = seq_len
    B = BS // S
    H = num_heads
    hd = D // H

    # Fused QKV projection (1/sqrt(hd) folded into Q); MXU M dimension = B*S.
    qkv = jnp.dot(x.astype(jnp.bfloat16), in_w_ref[...],
                  preferred_element_type=jnp.float32) + in_b_ref[...]
    q = qkv[:, :D].astype(jnp.bfloat16)
    k = qkv[:, D:2 * D].astype(jnp.bfloat16)
    v = qkv[:, 2 * D:].astype(jnp.bfloat16)

    # Attention: batched over the batch axis per head.  Each head's context is
    # written into its lane slice of ctx_scratch so the output projection is a
    # single (BS, D) @ (D, D) matmul with full K=D contraction depth.
    for h in range(H):
        sl = slice(h * hd, (h + 1) * hd)
        qh = q[:, sl].reshape(B, S, hd)
        kh = k[:, sl].reshape(B, S, hd)
        vh = v[:, sl].reshape(B, S, hd)
        s = jnp.einsum("bqd,bkd->bqk", qh, kh,
                       preferred_element_type=jnp.float32)        # (B, S, S)
        s = s - jnp.max(s, axis=-1, keepdims=True)
        p = jnp.exp(s)
        p = p * pl.reciprocal(jnp.sum(p, axis=-1, keepdims=True), approx=True)
        oh = jnp.einsum("bqk,bkd->bqd", p.astype(jnp.bfloat16), vh,
                        preferred_element_type=jnp.float32)       # (B, S, hd)
        ctx_scratch[:, sl] = oh.reshape(BS, hd)

    attn = jnp.dot(ctx_scratch[...].astype(jnp.bfloat16), out_w_ref[...],
                   preferred_element_type=jnp.float32) + out_b_ref[...]

    # Residual + LayerNorm 1 (f32).
    x1 = _layernorm(x + attn, ln1_w_ref[...], ln1_b_ref[...])

    # FFN: Linear -> ReLU -> Linear (bf16 matmuls, f32 accumulate).
    # TODO(synk): for large D/F configs on v7x, tile the F axis of ffn1/ffn2
    # (extra grid dim) so double-buffered weights stay inside 64 MiB VMEM.
    h1 = jnp.dot(x1.astype(jnp.bfloat16), ffn1_w_ref[...],
                 preferred_element_type=jnp.float32) + ffn1_b_ref[...]
    h1 = jnp.maximum(h1, 0.0)
    ffn = jnp.dot(h1.astype(jnp.bfloat16), ffn2_w_ref[...],
                  preferred_element_type=jnp.float32) + ffn2_b_ref[...]

    # Residual + LayerNorm 2 (f32); keep activation resident for next layer.
    x2 = _layernorm(x1 + ffn, ln2_w_ref[...], ln2_b_ref[...])
    x_scratch[...] = x2

    # Last layer: fold ln_f in and emit the bf16 activation for fc_out.
    @pl.when(l == pl.num_programs(0) - 1)
    def _():
        xn = _layernorm(x2, lnf_w_ref[...], lnf_b_ref[...])
        o_ref[...] = xn.astype(o_ref.dtype)


def run_transformer_layers(x2d, kp, num_heads, seq_len):
    BS, D = x2d.shape
    L = kp["in_w"].shape[0]
    F = kp["ffn1_w"].shape[2]
    B = BS // seq_len

    weight_names = ("in_w", "in_b", "out_w", "out_b", "ln1_w", "ln1_b",
                    "ffn1_w", "ffn1_b", "ffn2_w", "ffn2_b", "ln2_w", "ln2_b")
    per_layer_bytes = sum(int(kp[n].nbytes) // L for n in weight_names)
    temps = (6 * BS * 3 * D                         # qkv f32 + bf16 copies
             + 8 * B * seq_len * seq_len * num_heads  # scores + probs (f32)
             + 6 * BS * F                           # FFN hidden f32 + bf16
             + 8 * 4 * BS * D)                      # misc f32 activations
    resident = (2 * per_layer_bytes                 # double-buffered weights
                + 2 * 4 * BS * D                    # x input block
                + 2 * 2 * BS * D                    # bf16 output block
                + 2 * 4 * BS * D                    # f32 scratches
                + temps)

    def wspec(shape):
        nd = len(shape) - 1
        return pl.BlockSpec((None,) + tuple(shape[1:]),
                            lambda l, _nd=nd: (l,) + (0,) * _nd)

    # TODO(synk): on v7x, split the B*S (row) axis across the two TensorCores
    # for large S so the second core is not idle in this kernel.
    kernel = functools.partial(fused_blocks_kernel, num_heads, seq_len)
    return pl.pallas_call(
        kernel,
        out_shape=jax.ShapeDtypeStruct((BS, D), jnp.bfloat16),
        grid=(L,),
        in_specs=[
            pl.BlockSpec((BS, D), lambda l: (0, 0)),
            wspec(kp["in_w"].shape), wspec(kp["in_b"].shape),
            wspec(kp["out_w"].shape), wspec(kp["out_b"].shape),
            wspec(kp["ln1_w"].shape), wspec(kp["ln1_b"].shape),
            wspec(kp["ffn1_w"].shape), wspec(kp["ffn1_b"].shape),
            wspec(kp["ffn2_w"].shape), wspec(kp["ffn2_b"].shape),
            wspec(kp["ln2_w"].shape), wspec(kp["ln2_b"].shape),
            pl.BlockSpec((1, D), lambda l: (0, 0)),
            pl.BlockSpec((1, D), lambda l: (0, 0)),
        ],
        out_specs=pl.BlockSpec((BS, D), lambda l: (0, 0)),
        scratch_shapes=[pltpu.VMEM((BS, D), jnp.float32),
                        pltpu.VMEM((BS, D), jnp.float32)],
        compiler_params=pltpu.CompilerParams(
            dimension_semantics=("arbitrary",),
            vmem_limit_bytes=_vmem_budget(resident)),
    )(x2d, kp["in_w"], kp["in_b"], kp["out_w"], kp["out_b"],
      kp["ln1_w"], kp["ln1_b"],
      kp["ffn1_w"], kp["ffn1_b"], kp["ffn2_w"], kp["ffn2_b"],
      kp["ln2_w"], kp["ln2_b"], kp["lnf_w"], kp["lnf_b"])


# ----------------------------------------------------------------------------
# Final kernel: fc_out, grid over vocab tiles only (fc_w streamed once),
# B*S rows fed to the MXU, tn=256-wide lane-dense output tiles.
# ----------------------------------------------------------------------------
def final_kernel(xn_ref, fc_w_ref, fc_b_ref, o_ref):
    o_ref[...] = jnp.dot(xn_ref[...], fc_w_ref[...],
                         preferred_element_type=jnp.float32) + fc_b_ref[...]


def run_final(xn, kp):
    BS, D = xn.shape
    tn = kp["tn"]
    Vp = kp["fc_w"].shape[1]
    NV = Vp // tn
    V = kp["vocab_size"]

    resident = (2 * (D * tn * 2 + tn * 4)   # fc_w bf16 + fc_b f32 (x2 buffers)
                + 2 * BS * D * 2            # xn bf16 block
                + 2 * BS * tn * 4           # f32 output block (x2 buffers)
                + 4 * BS * tn)              # matmul temporaries

    logits = pl.pallas_call(
        final_kernel,
        out_shape=jax.ShapeDtypeStruct((BS, Vp), jnp.float32),
        grid=(NV,),
        in_specs=[
            pl.BlockSpec((BS, D), lambda j: (0, 0)),
            pl.BlockSpec((D, tn), lambda j: (0, j)),
            pl.BlockSpec((1, tn), lambda j: (0, j)),
        ],
        out_specs=pl.BlockSpec((BS, tn), lambda j: (0, j)),
        compiler_params=pltpu.CompilerParams(
            dimension_semantics=("parallel",),   # megacore split over vocab
            vmem_limit_bytes=_vmem_budget(resident)),
    )(xn, kp["fc_w"], kp["fc_b"])
    if Vp != V:
        logits = logits[:, :V]
    return logits


# ----------------------------------------------------------------------------
# Parameter construction (deterministic, synthetic, PyTorch conventions)
# ----------------------------------------------------------------------------
def sinusoidal_pe(max_len, dim):
    position = jnp.arange(max_len, dtype=jnp.float32)[:, None]
    div_term = jnp.exp(
        jnp.arange(0, dim, 2, dtype=jnp.float32) * (-math.log(10000.0) / dim))
    pe = jnp.zeros((max_len, dim), jnp.float32)
    pe = pe.at[:, 0::2].set(jnp.sin(position * div_term))
    pe = pe.at[:, 1::2].set(jnp.cos(position * div_term))
    return pe


def init_block_params(key, dim, num_heads, ffn_dim):
    ks = jax.random.split(key, 6)
    s = 0.02
    return {
        "in_w": s * jax.random.normal(ks[0], (3 * dim, dim), jnp.float32),
        "in_b": s * jax.random.normal(ks[1], (1, 3 * dim), jnp.float32),
        "out_w": s * jax.random.normal(ks[2], (dim, dim), jnp.float32),
        "out_b": jnp.zeros((1, dim), jnp.float32),
        "ln1_w": jnp.ones((1, dim), jnp.float32),
        "ln1_b": jnp.zeros((1, dim), jnp.float32),
        "ffn1_w": s * jax.random.normal(ks[3], (ffn_dim, dim), jnp.float32),
        "ffn1_b": s * jax.random.normal(ks[4], (1, ffn_dim), jnp.float32),
        "ffn2_w": s * jax.random.normal(ks[5], (dim, ffn_dim), jnp.float32),
        "ffn2_b": jnp.zeros((1, dim), jnp.float32),
        "ln2_w": jnp.ones((1, dim), jnp.float32),
        "ln2_b": jnp.zeros((1, dim), jnp.float32),
    }


def init_model_params(key, num_layers, num_heads, ffn_dim, dim, vocab_size,
                      block_size):
    keys = jax.random.split(key, num_layers + 3)
    blocks = [init_block_params(keys[i], dim, num_heads, ffn_dim)
              for i in range(num_layers)]
    # shard1 = even-indexed blocks, shard2 = odd-indexed blocks (module order).
    shard1 = [blocks[i] for i in range(num_layers) if i % 2 == 0]
    shard2 = [blocks[i] for i in range(num_layers) if i % 2 == 1]
    return {
        "tok_emb": 0.02 * jax.random.normal(
            keys[num_layers], (vocab_size, dim), jnp.float32),
        "pe": sinusoidal_pe(block_size, dim),
        "shard1": shard1,
        "shard2": shard2,
        "lnf_w": jnp.ones((1, dim), jnp.float32),
        "lnf_b": jnp.zeros((1, dim), jnp.float32),
        "fc_w": 0.02 * jax.random.normal(
            keys[num_layers + 1], (vocab_size, dim), jnp.float32),
        "fc_b": jnp.zeros((1, vocab_size), jnp.float32),
    }


def prepare_kernel_params(params, num_heads, tn=256):
    """Pre-transpose / stack / cast weights once on the host for the kernels."""
    blocks = list(params["shard1"]) + list(params["shard2"])  # execution order
    L = len(blocks)
    D = blocks[0]["in_w"].shape[1]
    hd = D // num_heads
    scale = 1.0 / math.sqrt(hd)

    def stack(name):
        return jnp.stack([b[name] for b in blocks], axis=0)

    in_w = stack("in_w")                                   # (L, 3D, D)
    in_b = stack("in_b")                                   # (L, 1, 3D)
    # Fold the 1/sqrt(hd) attention scale into the Q projection weight + bias.
    in_w = in_w.at[:, :D, :].multiply(scale)
    in_b = in_b.at[:, :, :D].multiply(scale)

    kp = {
        "in_w": jnp.transpose(in_w, (0, 2, 1)).astype(jnp.bfloat16),  # (L,D,3D)
        "in_b": in_b,
        "out_w": jnp.transpose(stack("out_w"), (0, 2, 1)).astype(jnp.bfloat16),
        "out_b": stack("out_b"),
        "ln1_w": stack("ln1_w"), "ln1_b": stack("ln1_b"),
        "ffn1_w": jnp.transpose(stack("ffn1_w"), (0, 2, 1)).astype(jnp.bfloat16),
        "ffn1_b": stack("ffn1_b"),
        "ffn2_w": jnp.transpose(stack("ffn2_w"), (0, 2, 1)).astype(jnp.bfloat16),
        "ffn2_b": stack("ffn2_b"),
        "ln2_w": stack("ln2_w"), "ln2_b": stack("ln2_b"),
        "tok_emb": params["tok_emb"],
        "pe": params["pe"],
        "lnf_w": params["lnf_w"], "lnf_b": params["lnf_b"],
    }

    # Vocab projection: pre-transpose to (D, V), pad V to a multiple of tn.
    fc_w_t = params["fc_w"].T
    fc_b = params["fc_b"]
    V = fc_w_t.shape[1]
    Vp = ((V + tn - 1) // tn) * tn
    if Vp != V:
        fc_w_t = jnp.pad(fc_w_t, ((0, 0), (0, Vp - V)))
        fc_b = jnp.pad(fc_b, ((0, 0), (0, Vp - V)))
    kp["fc_w"] = fc_w_t.astype(jnp.bfloat16)               # (D, Vp) bf16
    kp["fc_b"] = fc_b                                      # (1, Vp) f32
    kp["vocab_size"] = V
    kp["tn"] = tn
    return kp


# ----------------------------------------------------------------------------
# Full forward pass (targets=None -> loss is None, matching the module)
# ----------------------------------------------------------------------------
def transformer_forward(idx, kparams, num_heads):
    B, S = idx.shape
    D = kparams["tok_emb"].shape[1]
    x = kparams["tok_emb"][idx]                  # (B, S, D) gather (glue)
    x = x + kparams["pe"][:S][None, :, :]        # sinusoidal positional emb.
    x2d = x.reshape(B * S, D)                    # fold batch into rows
    xn = run_transformer_layers(x2d, kparams, num_heads, seq_len=S)
    logits = run_final(xn, kparams)              # (B*S, V)
    return logits.reshape(B, S, -1), None
    # TODO(synk): cross-entropy loss branch (targets is not None) not exercised.


# ----------------------------------------------------------------------------
# Pure-JAX f32 reference for sanity checking (uses the original torch-layout
# parameters, no scale folding / no bf16).
# ----------------------------------------------------------------------------
def _ref_block(x, p, num_heads):
    B, S, D = x.shape
    hd = D // num_heads
    qkv = jnp.einsum("bsd,ed->bse", x, p["in_w"]) + p["in_b"][0]
    q, k, v = qkv[..., :D], qkv[..., D:2 * D], qkv[..., 2 * D:]
    q = q.reshape(B, S, num_heads, hd).transpose(0, 2, 1, 3)
    k = k.reshape(B, S, num_heads, hd).transpose(0, 2, 1, 3)
    v = v.reshape(B, S, num_heads, hd).transpose(0, 2, 1, 3)
    s = jnp.einsum("bhqd,bhkd->bhqk", q, k) / math.sqrt(hd)
    a = jax.nn.softmax(s, axis=-1)
    o = jnp.einsum("bhqk,bhkd->bhqd", a, v).transpose(0, 2, 1, 3).reshape(B, S, D)
    o = jnp.einsum("bsd,ed->bse", o, p["out_w"]) + p["out_b"][0]
    x1 = _layernorm(x + o, p["ln1_w"][0], p["ln1_b"][0])
    h = jax.nn.relu(jnp.einsum("bsd,fd->bsf", x1, p["ffn1_w"]) + p["ffn1_b"][0])
    f = jnp.einsum("bsf,df->bsd", h, p["ffn2_w"]) + p["ffn2_b"][0]
    return _layernorm(x1 + f, p["ln2_w"][0], p["ln2_b"][0])


def _ref_forward(idx, params, num_heads):
    S = idx.shape[1]
    x = params["tok_emb"][idx] + params["pe"][:S][None, :, :]
    for blk in params["shard1"]:
        x = _ref_block(x, blk, num_heads)
    for blk in params["shard2"]:
        x = _ref_block(x, blk, num_heads)
    x = _layernorm(x, params["lnf_w"][0], params["lnf_b"][0])
    return jnp.einsum("bsd,vd->bsv", x, params["fc_w"]) + params["fc_b"][0]


# ----------------------------------------------------------------------------
if __name__ == "__main__":
    # Small configuration, chosen lane-aligned (D = 128, V multiple of 128).
    num_layers, num_heads, ffn_dim, dim = 3, 4, 256, 128
    vocab_size, block_size = 256, 16
    B, S = 2, 16

    key = jax.random.PRNGKey(0)
    k_params, k_idx = jax.random.split(key)
    params = init_model_params(k_params, num_layers, num_heads, ffn_dim, dim,
                               vocab_size, block_size)
    kparams = prepare_kernel_params(params, num_heads)
    idx = jax.random.randint(k_idx, (B, S), 0, vocab_size, dtype=jnp.int32)

    logits, loss = transformer_forward(idx, kparams, num_heads)
    logits = jax.block_until_ready(logits)

    assert logits.shape == (B, S, vocab_size)
    assert loss is None

    ref = jax.block_until_ready(_ref_forward(idx, params, num_heads))
    # Tolerance loosened vs the f32 reference because matmuls run in bf16.
    np.testing.assert_allclose(np.asarray(logits), np.asarray(ref),
                               rtol=2e-2, atol=2e-2)
    print("KERNEL_OK")
</pallas_src>

<mosaic_0001>
module attributes {stable_mosaic.version = 11 : i64} {
  func.func @fused_blocks_kernel(%arg0: i32, %arg1: memref<32x128xf32, #tpu.memory_space<vmem>>, %arg2: memref<1x128x384xbf16, #tpu.memory_space<vmem>>, %arg3: memref<1x1x384xf32, #tpu.memory_space<vmem>>, %arg4: memref<1x128x128xbf16, #tpu.memory_space<vmem>>, %arg5: memref<1x1x128xf32, #tpu.memory_space<vmem>>, %arg6: memref<1x1x128xf32, #tpu.memory_space<vmem>>, %arg7: memref<1x1x128xf32, #tpu.memory_space<vmem>>, %arg8: memref<1x128x256xbf16, #tpu.memory_space<vmem>>, %arg9: memref<1x1x256xf32, #tpu.memory_space<vmem>>, %arg10: memref<1x256x128xbf16, #tpu.memory_space<vmem>>, %arg11: memref<1x1x128xf32, #tpu.memory_space<vmem>>, %arg12: memref<1x1x128xf32, #tpu.memory_space<vmem>>, %arg13: memref<1x1x128xf32, #tpu.memory_space<vmem>>, %arg14: memref<1x128xf32, #tpu.memory_space<vmem>>, %arg15: memref<1x128xf32, #tpu.memory_space<vmem>>, %arg16: memref<32x128xbf16, #tpu.memory_space<vmem>>, %arg17: memref<32x128xf32, #tpu.memory_space<vmem>>, %arg18: memref<32x128xf32, #tpu.memory_space<vmem>>) attributes {dimension_semantics = [#tpu.dimension_semantics<arbitrary>], iteration_bounds = array<i64: 3>, scalar_prefetch = 0 : i64, scratch_operands = 2 : i64, tpu.core_type = #tpu.core_type<tc>, window_params = [{pipeline_mode = #tpu.pipeline_mode<synchronous>, transform_indices = @transform_0, window_bounds = array<i64: 32, 128>}, {transform_indices = @transform_1, window_bounds = array<i64: 1, 128, 384>}, {transform_indices = @transform_2, window_bounds = array<i64: 1, 1, 384>}, {transform_indices = @transform_3, window_bounds = array<i64: 1, 128, 128>}, {transform_indices = @transform_4, window_bounds = array<i64: 1, 1, 128>}, {transform_indices = @transform_5, window_bounds = array<i64: 1, 1, 128>}, {transform_indices = @transform_6, window_bounds = array<i64: 1, 1, 128>}, {transform_indices = @transform_7, window_bounds = array<i64: 1, 128, 256>}, {transform_indices = @transform_8, window_bounds = array<i64: 1, 1, 256>}, {transform_indices = @transform_9, window_bounds = array<i64: 1, 256, 128>}, {transform_indices = @transform_10, window_bounds = array<i64: 1, 1, 128>}, {transform_indices = @transform_11, window_bounds = array<i64: 1, 1, 128>}, {transform_indices = @transform_12, window_bounds = array<i64: 1, 1, 128>}, {pipeline_mode = #tpu.pipeline_mode<synchronous>, transform_indices = @transform_13, window_bounds = array<i64: 1, 128>}, {pipeline_mode = #tpu.pipeline_mode<synchronous>, transform_indices = @transform_14, window_bounds = array<i64: 1, 128>}, {pipeline_mode = #tpu.pipeline_mode<synchronous>, transform_indices = @transform_15, window_bounds = array<i64: 32, 128>}]} {
    %c0_i32 = arith.constant 0 : i32
    %0 = arith.cmpi eq, %arg0, %c0_i32 : i32
    %1 = arith.extui %0 : i1 to i32
    %c0_i32_0 = arith.constant 0 : i32
    %2 = arith.cmpi ne, %1, %c0_i32_0 : i32
    scf.if %2 {
      %c0_78 = arith.constant 0 : index
      %c0_79 = arith.constant 0 : index
      %187 = vector.load %arg1[%c0_78, %c0_79] : memref<32x128xf32, #tpu.memory_space<vmem>>, vector<32x128xf32>
      %c0_80 = arith.constant 0 : index
      %c0_81 = arith.constant 0 : index
      %188 = vector.load %arg17[%c0_80, %c0_81] : memref<32x128xf32, #tpu.memory_space<vmem>>, vector<32x128xf32>
      tpu.vector_store %arg17[%c0_80, %c0_81], %187 {strides = array<i32>} : memref<32x128xf32, #tpu.memory_space<vmem>>, vector<32x128xf32>,
    } else {
    }
    %c0 = arith.constant 0 : index
    %c0_1 = arith.constant 0 : index
    %3 = vector.load %arg17[%c0, %c0_1] : memref<32x128xf32, #tpu.memory_space<vmem>>, vector<32x128xf32>
    %4 = arith.truncf %3 : vector<32x128xf32> to vector<32x128xbf16>
    %c0_2 = arith.constant 0 : index
    %c0_3 = arith.constant 0 : index
    %c0_4 = arith.constant 0 : index
    %5 = vector.load %arg2[%c0_2, %c0_3, %c0_4] : memref<1x128x384xbf16, #tpu.memory_space<vmem>>, vector<1x128x384xbf16>
    %6 = vector.shape_cast %5 : vector<1x128x384xbf16> to vector<128x384xbf16>
    %cst = arith.constant dense<0.000000e+00> : vector<32x384xf32>
    %7 = tpu.matmul %4, %6, %cst {dimension_numbers = #tpu.dot_dimension_numbers<[1], [0], [0], [1], [0, 0, 1, 1], [], []>} : vector<32x128xbf16>, vector<128x384xbf16>, vector<32x384xf32> -> vector<32x384xf32>
    %c0_5 = arith.constant 0 : index
    %c0_6 = arith.constant 0 : index
    %c0_7 = arith.constant 0 : index
    %8 = vector.load %arg3[%c0_5, %c0_6, %c0_7] : memref<1x1x384xf32, #tpu.memory_space<vmem>>, vector<1x1x384xf32>
    %9 = vector.shape_cast %8 : vector<1x1x384xf32> to vector<1x384xf32>
    %10 = vector.broadcast %9 : vector<1x384xf32> to vector<32x384xf32>
    %11 = arith.addf %7, %10 : vector<32x384xf32>
    %12 = vector.extract_strided_slice %11 {offsets = [0, 0], sizes = [32, 128], strides = [1, 1]} : vector<32x384xf32> to vector<32x128xf32>
    %13 = arith.truncf %12 : vector<32x128xf32> to vector<32x128xbf16>
    %14 = vector.extract_strided_slice %11 {offsets = [0, 128], sizes = [32, 128], strides = [1, 1]} : vector<32x384xf32> to vector<32x128xf32>
    %15 = arith.truncf %14 : vector<32x128xf32> to vector<32x128xbf16>
    %16 = vector.extract_strided_slice %11 {offsets = [0, 256], sizes = [32, 128], strides = [1, 1]} : vector<32x384xf32> to vector<32x128xf32>
    %17 = arith.truncf %16 : vector<32x128xf32> to vector<32x128xbf16>
    %18 = vector.extract_strided_slice %13 {offsets = [0, 0], sizes = [32, 32], strides = [1, 1]} : vector<32x128xbf16> to vector<32x32xbf16>
    %19 = vector.shape_cast %18 : vector<32x32xbf16> to vector<2x16x32xbf16>
    %20 = vector.extract_strided_slice %15 {offsets = [0, 0], sizes = [32, 32], strides = [1, 1]} : vector<32x128xbf16> to vector<32x32xbf16>
    %21 = vector.shape_cast %20 : vector<32x32xbf16> to vector<2x16x32xbf16>
    %22 = vector.extract_strided_slice %17 {offsets = [0, 0], sizes = [32, 32], strides = [1, 1]} : vector<32x128xbf16> to vector<32x32xbf16>
    %23 = vector.shape_cast %22 : vector<32x32xbf16> to vector<2x16x32xbf16>
    "tpu.trace_start"() <{level = 10 : i32, message = "bqd,bkd->bqk"}> : () -> ()
    %cst_8 = arith.constant dense<0.000000e+00> : vector<2x16x16xf32>
    %24 = tpu.matmul %19, %21, %cst_8 {dimension_numbers = #tpu.dot_dimension_numbers<[2], [2], [1], [1], [0, 0, 0, 1, 1, 1], [0], [0]>} : vector<2x16x32xbf16>, vector<2x16x32xbf16>, vector<2x16x16xf32> -> vector<2x16x16xf32>
    "tpu.trace_stop"() : () -> ()
    %cst_9 = arith.constant dense<0xFF800000> : vector<2x16xf32>
    %25 = vector.multi_reduction <maximumf>, %24, %cst_9 [2] : vector<2x16x16xf32> to vector<2x16xf32>
    %26 = vector.shape_cast %25 : vector<2x16xf32> to vector<2x16x1xf32>
    %27 = vector.broadcast %26 : vector<2x16x1xf32> to vector<2x16x16xf32>
    %28 = arith.subf %24, %27 : vector<2x16x16xf32>
    %29 = math.exp %28 : vector<2x16x16xf32>
    %cst_10 = arith.constant dense<0.000000e+00> : vector<2x16xf32>
    %30 = vector.multi_reduction <add>, %29, %cst_10 [2] : vector<2x16x16xf32> to vector<2x16xf32>
    %31 = vector.shape_cast %30 : vector<2x16xf32> to vector<2x16x1xf32>
    %32 = tpu.reciprocal %31 {approx = true} : vector<2x16x1xf32> -> vector<2x16x1xf32>
    %33 = vector.broadcast %32 : vector<2x16x1xf32> to vector<2x16x16xf32>
    %34 = arith.mulf %29, %33 : vector<2x16x16xf32>
    %35 = arith.truncf %34 : vector<2x16x16xf32> to vector<2x16x16xbf16>
    "tpu.trace_start"() <{level = 10 : i32, message = "bqk,bkd->bqd"}> : () -> ()
    %cst_11 = arith.constant dense<0.000000e+00> : vector<2x16x32xf32>
    %36 = tpu.matmul %35, %23, %cst_11 {dimension_numbers = #tpu.dot_dimension_numbers<[2], [1], [1], [2], [0, 0, 0, 1, 1, 2], [0], [0]>} : vector<2x16x16xbf16>, vector<2x16x32xbf16>, vector<2x16x32xf32> -> vector<2x16x32xf32>
    "tpu.trace_stop"() : () -> ()
    %37 = vector.shape_cast %36 : vector<2x16x32xf32> to vector<32x32xf32>
    %c0_12 = arith.constant 0 : index
    %c0_13 = arith.constant 0 : index
    %38 = vector.load %arg18[%c0_12, %c0_13] : memref<32x128xf32, #tpu.memory_space<vmem>>, vector<32x32xf32>
    tpu.vector_store %arg18[%c0_12, %c0_13], %37 {strides = array<i32>} : memref<32x128xf32, #tpu.memory_space<vmem>>, vector<32x32xf32>,
    %39 = vector.extract_strided_slice %13 {offsets = [0, 32], sizes = [32, 32], strides = [1, 1]} : vector<32x128xbf16> to vector<32x32xbf16>
    %40 = vector.shape_cast %39 : vector<32x32xbf16> to vector<2x16x32xbf16>
    %41 = vector.extract_strided_slice %15 {offsets = [0, 32], sizes = [32, 32], strides = [1, 1]} : vector<32x128xbf16> to vector<32x32xbf16>
    %42 = vector.shape_cast %41 : vector<32x32xbf16> to vector<2x16x32xbf16>
    %43 = vector.extract_strided_slice %17 {offsets = [0, 32], sizes = [32, 32], strides = [1, 1]} : vector<32x128xbf16> to vector<32x32xbf16>
    %44 = vector.shape_cast %43 : vector<32x32xbf16> to vector<2x16x32xbf16>
    "tpu.trace_start"() <{level = 10 : i32, message = "bqd,bkd->bqk"}> : () -> ()
    %cst_14 = arith.constant dense<0.000000e+00> : vector<2x16x16xf32>
    %45 = tpu.matmul %40, %42, %cst_14 {dimension_numbers = #tpu.dot_dimension_numbers<[2], [2], [1], [1], [0, 0, 0, 1, 1, 1], [0], [0]>} : vector<2x16x32xbf16>, vector<2x16x32xbf16>, vector<2x16x16xf32> -> vector<2x16x16xf32>
    "tpu.trace_stop"() : () -> ()
    %cst_15 = arith.constant dense<0xFF800000> : vector<2x16xf32>
    %46 = vector.multi_reduction <maximumf>, %45, %cst_15 [2] : vector<2x16x16xf32> to vector<2x16xf32>
    %47 = vector.shape_cast %46 : vector<2x16xf32> to vector<2x16x1xf32>
    %48 = vector.broadcast %47 : vector<2x16x1xf32> to vector<2x16x16xf32>
    %49 = arith.subf %45, %48 : vector<2x16x16xf32>
    %50 = math.exp %49 : vector<2x16x16xf32>
    %cst_16 = arith.constant dense<0.000000e+00> : vector<2x16xf32>
    %51 = vector.multi_reduction <add>, %50, %cst_16 [2] : vector<2x16x16xf32> to vector<2x16xf32>
    %52 = vector.shape_cast %51 : vector<2x16xf32> to vector<2x16x1xf32>
    %53 = tpu.reciprocal %52 {approx = true} : vector<2x16x1xf32> -> vector<2x16x1xf32>
    %54 = vector.broadcast %53 : vector<2x16x1xf32> to vector<2x16x16xf32>
    %55 = arith.mulf %50, %54 : vector<2x16x16xf32>
    %56 = arith.truncf %55 : vector<2x16x16xf32> to vector<2x16x16xbf16>
    "tpu.trace_start"() <{level = 10 : i32, message = "bqk,bkd->bqd"}> : () -> ()
    %cst_17 = arith.constant dense<0.000000e+00> : vector<2x16x32xf32>
    %57 = tpu.matmul %56, %44, %cst_17 {dimension_numbers = #tpu.dot_dimension_numbers<[2], [1], [1], [2], [0, 0, 0, 1, 1, 2], [0], [0]>} : vector<2x16x16xbf16>, vector<2x16x32xbf16>, vector<2x16x32xf32> -> vector<2x16x32xf32>
    "tpu.trace_stop"() : () -> ()
    %58 = vector.shape_cast %57 : vector<2x16x32xf32> to vector<32x32xf32>
    %c0_18 = arith.constant 0 : index
    %c32 = arith.constant 32 : index
    %59 = vector.load %arg18[%c0_18, %c32] : memref<32x128xf32, #tpu.memory_space<vmem>>, vector<32x32xf32>
    tpu.vector_store %arg18[%c0_18, %c32], %58 {strides = array<i32>} : memref<32x128xf32, #tpu.memory_space<vmem>>, vector<32x32xf32>,
    %60 = vector.extract_strided_slice %13 {offsets = [0, 64], sizes = [32, 32], strides = [1, 1]} : vector<32x128xbf16> to vector<32x32xbf16>
    %61 = vector.shape_cast %60 : vector<32x32xbf16> to vector<2x16x32xbf16>
    %62 = vector.extract_strided_slice %15 {offsets = [0, 64], sizes = [32, 32], strides = [1, 1]} : vector<32x128xbf16> to vector<32x32xbf16>
    %63 = vector.shape_cast %62 : vector<32x32xbf16> to vector<2x16x32xbf16>
    %64 = vector.extract_strided_slice %17 {offsets = [0, 64], sizes = [32, 32], strides = [1, 1]} : vector<32x128xbf16> to vector<32x32xbf16>
    %65 = vector.shape_cast %64 : vector<32x32xbf16> to vector<2x16x32xbf16>
    "tpu.trace_start"() <{level = 10 : i32, message = "bqd,bkd->bqk"}> : () -> ()
    %cst_19 = arith.constant dense<0.000000e+00> : vector<2x16x16xf32>
    %66 = tpu.matmul %61, %63, %cst_19 {dimension_numbers = #tpu.dot_dimension_numbers<[2], [2], [1], [1], [0, 0, 0, 1, 1, 1], [0], [0]>} : vector<2x16x32xbf16>, vector<2x16x32xbf16>, vector<2x16x16xf32> -> vector<2x16x16xf32>
    "tpu.trace_stop"() : () -> ()
    %cst_20 = arith.constant dense<0xFF800000> : vector<2x16xf32>
    %67 = vector.multi_reduction <maximumf>, %66, %cst_20 [2] : vector<2x16x16xf32> to vector<2x16xf32>
    %68 = vector.shape_cast %67 : vector<2x16xf32> to vector<2x16x1xf32>
    %69 = vector.broadcast %68 : vector<2x16x1xf32> to vector<2x16x16xf32>
    %70 = arith.subf %66, %69 : vector<2x16x16xf32>
    %71 = math.exp %70 : vector<2x16x16xf32>
    %cst_21 = arith.constant dense<0.000000e+00> : vector<2x16xf32>
    %72 = vector.multi_reduction <add>, %71, %cst_21 [2] : vector<2x16x16xf32> to vector<2x16xf32>
    %73 = vector.shape_cast %72 : vector<2x16xf32> to vector<2x16x1xf32>
    %74 = tpu.reciprocal %73 {approx = true} : vector<2x16x1xf32> -> vector<2x16x1xf32>
    %75 = vector.broadcast %74 : vector<2x16x1xf32> to vector<2x16x16xf32>
    %76 = arith.mulf %71, %75 : vector<2x16x16xf32>
    %77 = arith.truncf %76 : vector<2x16x16xf32> to vector<2x16x16xbf16>
    "tpu.trace_start"() <{level = 10 : i32, message = "bqk,bkd->bqd"}> : () -> ()
    %cst_22 = arith.constant dense<0.000000e+00> : vector<2x16x32xf32>
    %78 = tpu.matmul %77, %65, %cst_22 {dimension_numbers = #tpu.dot_dimension_numbers<[2], [1], [1], [2], [0, 0, 0, 1, 1, 2], [0], [0]>} : vector<2x16x16xbf16>, vector<2x16x32xbf16>, vector<2x16x32xf32> -> vector<2x16x32xf32>
    "tpu.trace_stop"() : () -> ()
    %79 = vector.shape_cast %78 : vector<2x16x32xf32> to vector<32x32xf32>
    %c0_23 = arith.constant 0 : index
    %c64 = arith.constant 64 : index
    %80 = vector.load %arg18[%c0_23, %c64] : memref<32x128xf32, #tpu.memory_space<vmem>>, vector<32x32xf32>
    tpu.vector_store %arg18[%c0_23, %c64], %79 {strides = array<i32>} : memref<32x128xf32, #tpu.memory_space<vmem>>, vector<32x32xf32>,
    %81 = vector.extract_strided_slice %13 {offsets = [0, 96], sizes = [32, 32], strides = [1, 1]} : vector<32x128xbf16> to vector<32x32xbf16>
    %82 = vector.shape_cast %81 : vector<32x32xbf16> to vector<2x16x32xbf16>
    %83 = vector.extract_strided_slice %15 {offsets = [0, 96], sizes = [32, 32], strides = [1, 1]} : vector<32x128xbf16> to vector<32x32xbf16>
    %84 = vector.shape_cast %83 : vector<32x32xbf16> to vector<2x16x32xbf16>
    %85 = vector.extract_strided_slice %17 {offsets = [0, 96], sizes = [32, 32], strides = [1, 1]} : vector<32x128xbf16> to vector<32x32xbf16>
    %86 = vector.shape_cast %85 : vector<32x32xbf16> to vector<2x16x32xbf16>
    "tpu.trace_start"() <{level = 10 : i32, message = "bqd,bkd->bqk"}> : () -> ()
    %cst_24 = arith.constant dense<0.000000e+00> : vector<2x16x16xf32>
    %87 = tpu.matmul %82, %84, %cst_24 {dimension_numbers = #tpu.dot_dimension_numbers<[2], [2], [1], [1], [0, 0, 0, 1, 1, 1], [0], [0]>} : vector<2x16x32xbf16>, vector<2x16x32xbf16>, vector<2x16x16xf32> -> vector<2x16x16xf32>
    "tpu.trace_stop"() : () -> ()
    %cst_25 = arith.constant dense<0xFF800000> : vector<2x16xf32>
    %88 = vector.multi_reduction <maximumf>, %87, %cst_25 [2] : vector<2x16x16xf32> to vector<2x16xf32>
    %89 = vector.shape_cast %88 : vector<2x16xf32> to vector<2x16x1xf32>
    %90 = vector.broadcast %89 : vector<2x16x1xf32> to vector<2x16x16xf32>
    %91 = arith.subf %87, %90 : vector<2x16x16xf32>
    %92 = math.exp %91 : vector<2x16x16xf32>
    %cst_26 = arith.constant dense<0.000000e+00> : vector<2x16xf32>
    %93 = vector.multi_reduction <add>, %92, %cst_26 [2] : vector<2x16x16xf32> to vector<2x16xf32>
    %94 = vector.shape_cast %93 : vector<2x16xf32> to vector<2x16x1xf32>
    %95 = tpu.reciprocal %94 {approx = true} : vector<2x16x1xf32> -> vector<2x16x1xf32>
    %96 = vector.broadcast %95 : vector<2x16x1xf32> to vector<2x16x16xf32>
    %97 = arith.mulf %92, %96 : vector<2x16x16xf32>
    %98 = arith.truncf %97 : vector<2x16x16xf32> to vector<2x16x16xbf16>
    "tpu.trace_start"() <{level = 10 : i32, message = "bqk,bkd->bqd"}> : () -> ()
    %cst_27 = arith.constant dense<0.000000e+00> : vector<2x16x32xf32>
    %99 = tpu.matmul %98, %86, %cst_27 {dimension_numbers = #tpu.dot_dimension_numbers<[2], [1], [1], [2], [0, 0, 0, 1, 1, 2], [0], [0]>} : vector<2x16x16xbf16>, vector<2x16x32xbf16>, vector<2x16x32xf32> -> vector<2x16x32xf32>
    "tpu.trace_stop"() : () -> ()
    %100 = vector.shape_cast %99 : vector<2x16x32xf32> to vector<32x32xf32>
    %c0_28 = arith.constant 0 : index
    %c96 = arith.constant 96 : index
    %101 = vector.load %arg18[%c0_28, %c96] : memref<32x128xf32, #tpu.memory_space<vmem>>, vector<32x32xf32>
    tpu.vector_store %arg18[%c0_28, %c96], %100 {strides = array<i32>} : memref<32x128xf32, #tpu.memory_space<vmem>>, vector<32x32xf32>,
    %c0_29 = arith.constant 0 : index
    %c0_30 = arith.constant 0 : index
    %102 = vector.load %arg18[%c0_29, %c0_30] : memref<32x128xf32, #tpu.memory_space<vmem>>, vector<32x128xf32>
    %103 = arith.truncf %102 : vector<32x128xf32> to vector<32x128xbf16>
    %c0_31 = arith.constant 0 : index
    %c0_32 = arith.constant 0 : index
    %c0_33 = arith.constant 0 : index
    %104 = vector.load %arg4[%c0_31, %c0_32, %c0_33] : memref<1x128x128xbf16, #tpu.memory_space<vmem>>, vector<1x128x128xbf16>
    %105 = vector.shape_cast %104 : vector<1x128x128xbf16> to vector<128x128xbf16>
    %cst_34 = arith.constant dense<0.000000e+00> : vector<32x128xf32>
    %106 = tpu.matmul %103, %105, %cst_34 {dimension_numbers = #tpu.dot_dimension_numbers<[1], [0], [0], [1], [0, 0, 1, 1], [], []>} : vector<32x128xbf16>, vector<128x128xbf16>, vector<32x128xf32> -> vector<32x128xf32>
    %c0_35 = arith.constant 0 : index
    %c0_36 = arith.constant 0 : index
    %c0_37 = arith.constant 0 : index
    %107 = vector.load %arg5[%c0_35, %c0_36, %c0_37] : memref<1x1x128xf32, #tpu.memory_space<vmem>>, vector<1x1x128xf32>
    %108 = vector.shape_cast %107 : vector<1x1x128xf32> to vector<1x128xf32>
    %109 = vector.broadcast %108 : vector<1x128xf32> to vector<32x128xf32>
    %110 = arith.addf %106, %109 : vector<32x128xf32>
    %111 = arith.addf %3, %110 : vector<32x128xf32>
    %c0_38 = arith.constant 0 : index
    %c0_39 = arith.constant 0 : index
    %c0_40 = arith.constant 0 : index
    %112 = vector.load %arg6[%c0_38, %c0_39, %c0_40] : memref<1x1x128xf32, #tpu.memory_space<vmem>>, vector<1x1x128xf32>
    %113 = vector.shape_cast %112 : vector<1x1x128xf32> to vector<1x128xf32>
    %c0_41 = arith.constant 0 : index
    %c0_42 = arith.constant 0 : index
    %c0_43 = arith.constant 0 : index
    %114 = vector.load %arg7[%c0_41, %c0_42, %c0_43] : memref<1x1x128xf32, #tpu.memory_space<vmem>>, vector<1x1x128xf32>
    %115 = vector.shape_cast %114 : vector<1x1x128xf32> to vector<1x128xf32>
    %cst_44 = arith.constant dense<0.000000e+00> : vector<32xf32>
    %116 = vector.multi_reduction <add>, %111, %cst_44 [1] : vector<32x128xf32> to vector<32xf32>
    %117 = vector.shape_cast %116 : vector<32xf32> to vector<32x1xf32>
    %cst_45 = arith.constant 1.280000e+02 : f32
    %118 = vector.broadcast %cst_45 : f32 to vector<32x1xf32>
    %119 = arith.divf %117, %118 : vector<32x1xf32>
    %120 = vector.broadcast %119 : vector<32x1xf32> to vector<32x128xf32>
    %121 = arith.subf %111, %120 : vector<32x128xf32>
    %122 = arith.mulf %121, %121 : vector<32x128xf32>
    %cst_46 = arith.constant dense<0.000000e+00> : vector<32xf32>
    %123 = vector.multi_reduction <add>, %122, %cst_46 [1] : vector<32x128xf32> to vector<32xf32>
    %124 = vector.shape_cast %123 : vector<32xf32> to vector<32x1xf32>
    %cst_47 = arith.constant 1.280000e+02 : f32
    %125 = vector.broadcast %cst_47 : f32 to vector<32x1xf32>
    %126 = arith.divf %124, %125 : vector<32x1xf32>
    %127 = vector.broadcast %119 : vector<32x1xf32> to vector<32x128xf32>
    %128 = arith.subf %111, %127 : vector<32x128xf32>
    %cst_48 = arith.constant 9.99999974E-6 : f32
    %129 = vector.broadcast %cst_48 : f32 to vector<32x1xf32>
    %130 = arith.addf %126, %129 : vector<32x1xf32>
    %131 = math.rsqrt %130 : vector<32x1xf32>
    %132 = vector.broadcast %131 : vector<32x1xf32> to vector<32x128xf32>
    %133 = arith.mulf %128, %132 : vector<32x128xf32>
    %134 = vector.broadcast %113 : vector<1x128xf32> to vector<32x128xf32>
    %135 = arith.mulf %133, %134 : vector<32x128xf32>
    %136 = vector.broadcast %115 : vector<1x128xf32> to vector<32x128xf32>
    %137 = arith.addf %135, %136 : vector<32x128xf32>
    %138 = arith.truncf %137 : vector<32x128xf32> to vector<32x128xbf16>
    %c0_49 = arith.constant 0 : index
    %c0_50 = arith.constant 0 : index
    %c0_51 = arith.constant 0 : index
    %139 = vector.load %arg8[%c0_49, %c0_50, %c0_51] : memref<1x128x256xbf16, #tpu.memory_space<vmem>>, vector<1x128x256xbf16>
    %140 = vector.shape_cast %139 : vector<1x128x256xbf16> to vector<128x256xbf16>
    %cst_52 = arith.constant dense<0.000000e+00> : vector<32x256xf32>
    %141 = tpu.matmul %138, %140, %cst_52 {dimension_numbers = #tpu.dot_dimension_numbers<[1], [0], [0], [1], [0, 0, 1, 1], [], []>} : vector<32x128xbf16>, vector<128x256xbf16>, vector<32x256xf32> -> vector<32x256xf32>
    %c0_53 = arith.constant 0 : index
    %c0_54 = arith.constant 0 : index
    %c0_55 = arith.constant 0 : index
    %142 = vector.load %arg9[%c0_53, %c0_54, %c0_55] : memref<1x1x256xf32, #tpu.memory_space<vmem>>, vector<1x1x256xf32>
    %143 = vector.shape_cast %142 : vector<1x1x256xf32> to vector<1x256xf32>
    %144 = vector.broadcast %143 : vector<1x256xf32> to vector<32x256xf32>
    %145 = arith.addf %141, %144 : vector<32x256xf32>
    %cst_56 = arith.constant 0.000000e+00 : f32
    %146 = vector.broadcast %cst_56 : f32 to vector<32x256xf32>
    %147 = arith.maximumf %145, %146 : vector<32x256xf32>
    %148 = arith.truncf %147 : vector<32x256xf32> to vector<32x256xbf16>
    %c0_57 = arith.constant 0 : index
    %c0_58 = arith.constant 0 : index
    %c0_59 = arith.constant 0 : index
    %149 = vector.load %arg10[%c0_57, %c0_58, %c0_59] : memref<1x256x128xbf16, #tpu.memory_space<vmem>>, vector<1x256x128xbf16>
    %150 = vector.shape_cast %149 : vector<1x256x128xbf16> to vector<256x128xbf16>
    %cst_60 = arith.constant dense<0.000000e+00> : vector<32x128xf32>
    %151 = tpu.matmul %148, %150, %cst_60 {dimension_numbers = #tpu.dot_dimension_numbers<[1], [0], [0], [1], [0, 0, 1, 1], [], []>} : vector<32x256xbf16>, vector<256x128xbf16>, vector<32x128xf32> -> vector<32x128xf32>
    %c0_61 = arith.constant 0 : index
    %c0_62 = arith.constant 0 : index
    %c0_63 = arith.constant 0 : index
    %152 = vector.load %arg11[%c0_61, %c0_62, %c0_63] : memref<1x1x128xf32, #tpu.memory_space<vmem>>, vector<1x1x128xf32>
    %153 = vector.shape_cast %152 : vector<1x1x128xf32> to vector<1x128xf32>
    %154 = vector.broadcast %153 : vector<1x128xf32> to vector<32x128xf32>
    %155 = arith.addf %151, %154 : vector<32x128xf32>
    %156 = arith.addf %137, %155 : vector<32x128xf32>
    %c0_64 = arith.constant 0 : index
    %c0_65 = arith.constant 0 : index
    %c0_66 = arith.constant 0 : index
    %157 = vector.load %arg12[%c0_64, %c0_65, %c0_66] : memref<1x1x128xf32, #tpu.memory_space<vmem>>, vector<1x1x128xf32>
    %158 = vector.shape_cast %157 : vector<1x1x128xf32> to vector<1x128xf32>
    %c0_67 = arith.constant 0 : index
    %c0_68 = arith.constant 0 : index
    %c0_69 = arith.constant 0 : index
    %159 = vector.load %arg13[%c0_67, %c0_68, %c0_69] : memref<1x1x128xf32, #tpu.memory_space<vmem>>, vector<1x1x128xf32>
    %160 = vector.shape_cast %159 : vector<1x1x128xf32> to vector<1x128xf32>
    %cst_70 = arith.constant dense<0.000000e+00> : vector<32xf32>
    %161 = vector.multi_reduction <add>, %156, %cst_70 [1] : vector<32x128xf32> to vector<32xf32>
    %162 = vector.shape_cast %161 : vector<32xf32> to vector<32x1xf32>
    %cst_71 = arith.constant 1.280000e+02 : f32
    %163 = vector.broadcast %cst_71 : f32 to vector<32x1xf32>
    %164 = arith.divf %162, %163 : vector<32x1xf32>
    %165 = vector.broadcast %164 : vector<32x1xf32> to vector<32x128xf32>
    %166 = arith.subf %156, %165 : vector<32x128xf32>
    %167 = arith.mulf %166, %166 : vector<32x128xf32>
    %cst_72 = arith.constant dense<0.000000e+00> : vector<32xf32>
    %168 = vector.multi_reduction <add>, %167, %cst_72 [1] : vector<32x128xf32> to vector<32xf32>
    %169 = vector.shape_cast %168 : vector<32xf32> to vector<32x1xf32>
    %cst_73 = arith.constant 1.280000e+02 : f32
    %170 = vector.broadcast %cst_73 : f32 to vector<32x1xf32>
    %171 = arith.divf %169, %170 : vector<32x1xf32>
    %172 = vector.broadcast %164 : vector<32x1xf32> to vector<32x128xf32>
    %173 = arith.subf %156, %172 : vector<32x128xf32>
    %cst_74 = arith.constant 9.99999974E-6 : f32
    %174 = vector.broadcast %cst_74 : f32 to vector<32x1xf32>
    %175 = arith.addf %171, %174 : vector<32x1xf32>
    %176 = math.rsqrt %175 : vector<32x1xf32>
    %177 = vector.broadcast %176 : vector<32x1xf32> to vector<32x128xf32>
    %178 = arith.mulf %173, %177 : vector<32x128xf32>
    %179 = vector.broadcast %158 : vector<1x128xf32> to vector<32x128xf32>
    %180 = arith.mulf %178, %179 : vector<32x128xf32>
    %181 = vector.broadcast %160 : vector<1x128xf32> to vector<32x128xf32>
    %182 = arith.addf %180, %181 : vector<32x128xf32>
    %c0_75 = arith.constant 0 : index
    %c0_76 = arith.constant 0 : index
    %183 = vector.load %arg17[%c0_75, %c0_76] : memref<32x128xf32, #tpu.memory_space<vmem>>, vector<32x128xf32>
    tpu.vector_store %arg17[%c0_75, %c0_76], %182 {strides = array<i32>} : memref<32x128xf32, #tpu.memory_space<vmem>>, vector<32x128xf32>,
    %c2_i32 = arith.constant 2 : i32
    %184 = arith.cmpi eq, %arg0, %c2_i32 : i32
    %185 = arith.extui %184 : i1 to i32
    %c0_i32_77 = arith.constant 0 : i32
    %186 = arith.cmpi ne, %185, %c0_i32_77 : i32
    scf.if %186 {
      %c0_78 = arith.constant 0 : index
      %c0_79 = arith.constant 0 : index
      %187 = vector.load %arg14[%c0_78, %c0_79] : memref<1x128xf32, #tpu.memory_space<vmem>>, vector<1x128xf32>
      %c0_80 = arith.constant 0 : index
      %c0_81 = arith.constant 0 : index
      %188 = vector.load %arg15[%c0_80, %c0_81] : memref<1x128xf32, #tpu.memory_space<vmem>>, vector<1x128xf32>
      %cst_82 = arith.constant dense<0.000000e+00> : vector<32xf32>
      %189 = vector.multi_reduction <add>, %182, %cst_82 [1] : vector<32x128xf32> to vector<32xf32>
      %190 = vector.shape_cast %189 : vector<32xf32> to vector<32x1xf32>
      %cst_83 = arith.constant 1.280000e+02 : f32
      %191 = vector.broadcast %cst_83 : f32 to vector<32x1xf32>
      %192 = arith.divf %190, %191 : vector<32x1xf32>
      %193 = vector.broadcast %192 : vector<32x1xf32> to vector<32x128xf32>
      %194 = arith.subf %182, %193 : vector<32x128xf32>
      %195 = arith.mulf %194, %194 : vector<32x128xf32>
      %cst_84 = arith.constant dense<0.000000e+00> : vector<32xf32>
      %196 = vector.multi_reduction <add>, %195, %cst_84 [1] : vector<32x128xf32> to vector<32xf32>
      %197 = vector.shape_cast %196 : vector<32xf32> to vector<32x1xf32>
      %cst_85 = arith.constant 1.280000e+02 : f32
      %198 = vector.broadcast %cst_85 : f32 to vector<32x1xf32>
      %199 = arith.divf %197, %198 : vector<32x1xf32>
      %200 = vector.broadcast %192 : vector<32x1xf32> to vector<32x128xf32>
      %201 = arith.subf %182, %200 : vector<32x128xf32>
      %cst_86 = arith.constant 9.99999974E-6 : f32
      %202 = vector.broadcast %cst_86 : f32 to vector<32x1xf32>
      %203 = arith.addf %199, %202 : vector<32x1xf32>
      %204 = math.rsqrt %203 : vector<32x1xf32>
      %205 = vector.broadcast %204 : vector<32x1xf32> to vector<32x128xf32>
      %206 = arith.mulf %201, %205 : vector<32x128xf32>
      %207 = vector.broadcast %187 : vector<1x128xf32> to vector<32x128xf32>
      %208 = arith.mulf %206, %207 : vector<32x128xf32>
      %209 = vector.broadcast %188 : vector<1x128xf32> to vector<32x128xf32>
      %210 = arith.addf %208, %209 : vector<32x128xf32>
      %211 = arith.truncf %210 : vector<32x128xf32> to vector<32x128xbf16>
      %c0_87 = arith.constant 0 : index
      %c0_88 = arith.constant 0 : index
      %212 = vector.load %arg16[%c0_87, %c0_88] : memref<32x128xbf16, #tpu.memory_space<vmem>>, vector<32x128xbf16>
      tpu.vector_store %arg16[%c0_87, %c0_88], %211 {strides = array<i32>} : memref<32x128xbf16, #tpu.memory_space<vmem>>, vector<32x128xbf16>,
    } else {
    }
    return
  }
  func.func @transform_0(%arg0: i32) -> (i32, i32) {
    %c0_i32 = arith.constant 0 : i32
    %c0_i32_0 = arith.constant 0 : i32
    %c0_i32_1 = arith.constant 0 : i32
    return %c0_i32, %c0_i32_0 : i32, i32
  }
  func.func @transform_1(%arg0: i32) -> (i32, i32, i32) {
    %c0_i32 = arith.constant 0 : i32
    %c0_i32_0 = arith.constant 0 : i32
    %c0_i32_1 = arith.constant 0 : i32
    return %arg0, %c0_i32, %c0_i32_0 : i32, i32, i32
  }
  func.func @transform_2(%arg0: i32) -> (i32, i32, i32) {
    %c0_i32 = arith.constant 0 : i32
    %c0_i32_0 = arith.constant 0 : i32
    %c0_i32_1 = arith.constant 0 : i32
    return %arg0, %c0_i32, %c0_i32_0 : i32, i32, i32
  }
  func.func @transform_3(%arg0: i32) -> (i32, i32, i32) {
    %c0_i32 = arith.constant 0 : i32
    %c0_i32_0 = arith.constant 0 : i32
    %c0_i32_1 = arith.constant 0 : i32
    return %arg0, %c0_i32, %c0_i32_0 : i32, i32, i32
  }
  func.func @transform_4(%arg0: i32) -> (i32, i32, i32) {
    %c0_i32 = arith.constant 0 : i32
    %c0_i32_0 = arith.constant 0 : i32
    %c0_i32_1 = arith.constant 0 : i32
    return %arg0, %c0_i32, %c0_i32_0 : i32, i32, i32
  }
  func.func @transform_5(%arg0: i32) -> (i32, i32, i32) {
    %c0_i32 = arith.constant 0 : i32
    %c0_i32_0 = arith.constant 0 : i32
    %c0_i32_1 = arith.constant 0 : i32
    return %arg0, %c0_i32, %c0_i32_0 : i32, i32, i32
  }
  func.func @transform_6(%arg0: i32) -> (i32, i32, i32) {
    %c0_i32 = arith.constant 0 : i32
    %c0_i32_0 = arith.constant 0 : i32
    %c0_i32_1 = arith.constant 0 : i32
    return %arg0, %c0_i32, %c0_i32_0 : i32, i32, i32
  }
  func.func @transform_7(%arg0: i32) -> (i32, i32, i32) {
    %c0_i32 = arith.constant 0 : i32
    %c0_i32_0 = arith.constant 0 : i32
    %c0_i32_1 = arith.constant 0 : i32
    return %arg0, %c0_i32, %c0_i32_0 : i32, i32, i32
  }
  func.func @transform_8(%arg0: i32) -> (i32, i32, i32) {
    %c0_i32 = arith.constant 0 : i32
    %c0_i32_0 = arith.constant 0 : i32
    %c0_i32_1 = arith.constant 0 : i32
    return %arg0, %c0_i32, %c0_i32_0 : i32, i32, i32
  }
  func.func @transform_9(%arg0: i32) -> (i32, i32, i32) {
    %c0_i32 = arith.constant 0 : i32
    %c0_i32_0 = arith.constant 0 : i32
    %c0_i32_1 = arith.constant 0 : i32
    return %arg0, %c0_i32, %c0_i32_0 : i32, i32, i32
  }
  func.func @transform_10(%arg0: i32) -> (i32, i32, i32) {
    %c0_i32 = arith.constant 0 : i32
    %c0_i32_0 = arith.constant 0 : i32
    %c0_i32_1 = arith.constant 0 : i32
    return %arg0, %c0_i32, %c0_i32_0 : i32, i32, i32
  }
  func.func @transform_11(%arg0: i32) -> (i32, i32, i32) {
    %c0_i32 = arith.constant 0 : i32
    %c0_i32_0 = arith.constant 0 : i32
    %c0_i32_1 = arith.constant 0 : i32
    return %arg0, %c0_i32, %c0_i32_0 : i32, i32, i32
  }
  func.func @transform_12(%arg0: i32) -> (i32, i32, i32) {
    %c0_i32 = arith.constant 0 : i32
    %c0_i32_0 = arith.constant 0 : i32
    %c0_i32_1 = arith.constant 0 : i32
    return %arg0, %c0_i32, %c0_i32_0 : i32, i32, i32
  }
  func.func @transform_13(%arg0: i32) -> (i32, i32) {
    %c0_i32 = arith.constant 0 : i32
    %c0_i32_0 = arith.constant 0 : i32
    %c0_i32_1 = arith.constant 0 : i32
    return %c0_i32, %c0_i32_0 : i32, i32
  }
  func.func @transform_14(%arg0: i32) -> (i32, i32) {
    %c0_i32 = arith.constant 0 : i32
    %c0_i32_0 = arith.constant 0 : i32
    %c0_i32_1 = arith.constant 0 : i32
    return %c0_i32, %c0_i32_0 : i32, i32
  }
  func.func @transform_15(%arg0: i32) -> (i32, i32) {
    %c0_i32 = arith.constant 0 : i32
    %c0_i32_0 = arith.constant 0 : i32
    %c0_i32_1 = arith.constant 0 : i32
    return %c0_i32, %c0_i32_0 : i32, i32
  }
}

</mosaic_0001>

<bundles_post_ra>
// kernel: tpu_custom_call.1
= control target key start
LH: loop header
LB: loop body
LE: loop exit
PB: predicated region body
PF: predicated region fallthrough
CT: control target
= control target key end

     0   :  { %s4796_s0 = inlined_call_operand.hbm [shape: f32[32,128], index: 0, kind: input, shape index: {}]   ;;  %s4797_s1 = inlined_call_operand.hbm [shape: bf16[3,128,384], index: 1, kind: input, shape index: {}]   ;;  %s4798_s2 = inlined_call_operand.hbm [shape: f32[3,1,384], index: 2, kind: input, shape index: {}]   ;;  %s4799_s3 = inlined_call_operand.hbm [shape: bf16[3,128,128], index: 3, kind: input, shape index: {}]   ;;  %s4800_s4 = inlined_call_operand.vmem [shape: f32[3,1,128], index: 4, kind: input, shape index: {}]   ;;  %s4801_s5 = inlined_call_operand.vmem [shape: f32[3,1,128], index: 5, kind: input, shape index: {}]   ;;  %s4802_s6 = inlined_call_operand.hbm [shape: f32[3,1,128], index: 6, kind: input, shape index: {}]   ;;  %s4803_s7 = inlined_call_operand.hbm [shape: bf16[3,128,256], index: 7, kind: input, shape index: {}]   ;;  %s4804_s8 = inlined_call_operand.vmem [shape: f32[3,1,256], index: 8, kind: input, shape index: {}]   ;;  %s4805_s9 = inlined_call_operand.hbm [shape: bf16[3,256,128], index: 9, kind: input, shape index: {}]   ;;  %s4806_s10 = inlined_call_operand.vmem [shape: f32[3,1,128], index: 10, kind: input, shape index: {}]   ;;  %s4807_s11 = inlined_call_operand.vmem [shape: f32[3,1,128], index: 11, kind: input, shape index: {}]   ;;  %s4808_s12 = inlined_call_operand.vmem [shape: f32[3,1,128], index: 12, kind: input, shape index: {}]   ;;  %s4809_s13 = inlined_call_operand.vmem [shape: f32[1,128], index: 13, kind: input, shape index: {}]   ;;  %s4810_s14 = inlined_call_operand.vmem [shape: f32[1,128], index: 14, kind: input, shape index: {}]   ;;  %s4811_s15 = inlined_call_operand.hbm [shape: bf16[32,128], index: 15, kind: output, shape index: {}]  }
   0x1   :  { %4824 = sst [smem:[#allocation25_spill]] %s4796_s0 }
   0x2   :  { %4825 = sst [smem:[#allocation26_spill]] %s4797_s1 }
   0x3   :  { %4826 = sst [smem:[#allocation27_spill]] %s4798_s2 }
   0x4   :  { %4827 = sst [smem:[#allocation28_spill]] %s4799_s3 }
   0x5   :  { %4828 = sst [smem:[#allocation29_spill]] %s4802_s6 }
   0x6   :  { %4829 = sst [smem:[#allocation30_spill]] %s4803_s7 }
   0x7   :  { %4830 = sst [smem:[#allocation31_spill]] %s4804_s8 }
   0x8   :  { %4831 = sst [smem:[#allocation32_spill]] %s4805_s9 }
   0x9   :  { %4832 = sst [smem:[#allocation33_spill]] %s4807_s11 }
   0xa   :  { %4833 = sst [smem:[#allocation34_spill]] %s4808_s12 }
   0xb   :  { %4834 = sst [smem:[#allocation35_spill]] %s4809_s13 }
   0xc   :  { %4835 = sst [smem:[#allocation36_spill]] %s4810_s14 }
   0xd   :  { %4836 = sst [smem:[#allocation37_spill]] %s4811_s15 }
   0xe   :  { %20 = vsyncpa [#allocation5], 0 }
   0xf   :  { %21 = vsyncpa [#allocation8], 0 }
  0x10   :  { %23 = vsyncpa [#allocation8 + $0x1], 0 }
  0x11   :  { %24 = vsyncpa [#allocation11], 0 }
  0x12   :  { %26 = vsyncpa [#allocation11 + $0x1], 0 }
  0x13   :  { %27 = vsyncpa [#allocation14], 0 }
  0x14   :  { %29 = vsyncpa [#allocation14 + $0x1], 0 }
  0x15   :  { %30 = vsyncpa [#allocation6], 0  ;;  %s4068_s18 = smov 0   ;;  %s4070_s19 = smov 0  }
  0x16   :  { %s4072_s20 = smov 0   ;;  %s4074_s21 = smov 0  }
  0x17 LB: > { %4837 = sst [smem:[#allocation22_spill]] %s3961_s20  ;;  %s4089_s22 = sadd.s32 1, %s3965_s21   ;;  %s3965_s21 = sphi %s4074_s21, %s4876_s21   ;;  %s3961_s20 = sphi %s4072_s20, %s4878_s20   ;;  %s3957_s19 = sphi %s4070_s19, %s4880_s19   ;;  %s3953_s18 = sphi %s4068_s18, %s4879_s18  }
  0x18   : > { %4838 = sst [smem:[#allocation23_spill]] %s4089_s22  ;;  %s64_s23 = sadd.s32 1, %s3961_s20 }
  0x19   : > { %s61_s24 = ssub.s32 %s3965_s21, %s4089_s22  ;;  %p71_p0 = scmp.ne.s32.totalorder %s3961_s20, %s3957_s19 }
  0x1a   : > { %p62_p1 = scmp.eq.s32.totalorder %s61_s24, 0  ;;  %p72_p2 = scmp.eq.s32.totalorder %s3965_s21, 0 }
  0x1b   : > { %p3474_p3 = scmp.lt.s32.totalorder %s3965_s21, 3  ;;  %s4102_s26 = sand.u32 1, %s3965_s21  }
  0x1c   : > { %s4099_s25 = scalar_select %p62_p1, %s3961_s20, %s64_s23  }
  0x1d   : > { %p73_p4 = por %p72_p2, %p71_p0  ;;  %s4105_s27 = sand.u32 1, %s3961_s20  }
  0x1e   : > { %4839 = sst [smem:[#allocation24_spill]] %s4099_s25  ;;  %s3424_s28 = smul.u32 192, %s4105_s27 }
  0x1f   : > { %p4108_p5 = pnand %p3474_p3, %p73_p4  ;;  %s3425_s30 = smul.u32 3072, %s3965_s21 }
  0x20   : > { %s4841_s1 = sld [smem:[#allocation26_spill]]  ;;  %s473_s23 = scalar_lea.vmem [#allocation7], %s3424_s28 }
  0x21   : > { %s480_s25 = sshll.u32 %s473_s23, 4  ;;  %p4125_p7 = pneg %p4108_p5  ;;  %s4118_s25 = int_to_ptr.vmem [resolvable:$true] %s480_s25 }
  0x26   : > { %s4116_s24 = scalar_lea.hbm %s4841_s1, %s3425_s30  ;;  %s3702_s17 = scalar_lea.hbm %s4841_s1, 9216 }
  0x27   : > { %s3697_s22 = scalar_lea.hbm %s4116_s24, 3072  ;;  %p3703_p10 = scmp.lt.s32.totalorder %s4116_s24, %s4841_s1 }
  0x28   : > { %p3698_p6 = scmp.ne.s32.totalorder %s4116_s24, %s3697_s22  ;;  %p3704_p11 = scmp.lt.s32.totalorder %s3702_s17, %s3697_s22 }
  0x2a   : > { %p3700_p8 = pnand %p4125_p7, %p3698_p6  ;;  %p3705_p12 = por %p3704_p11, %p3703_p10 }
  0x2c   : > { %p3701_p9 = pneg %p3700_p8 }
  0x2e   : > { %p3706_p13 = pnand %p3705_p12, %p3701_p9 }
  0x30   : > { %3709 = shalt.err (!%p3706_p13)
}
  0x31   : > { %s3710_s20 = scalar_lea.vmem %s4118_s25, 3072  ;;  %s3967_s14 = smov [#allocation7]  }
  0x32   : > { %p3711_p0 = scmp.ne.s32.totalorder %s4118_s25, %s3710_s20  ;;  %s3715_s30 = sshll.u32 %s3967_s14, 4  ;;  %s3716_s30 = int_to_ptr.vmem [resolvable:$false] %s3715_s30 }
  0x33   : > { %s3717_s16 = scalar_lea.vmem %s3716_s30, 6144  ;;  %p3718_p3 = scmp.lt.s32.totalorder %s4118_s25, %s3716_s30 }
  0x34   : > { %p3713_p1 = pnand %p3711_p0, %p4125_p7  ;;  %p3719_p4 = scmp.lt.s32.totalorder %s3717_s16, %s3710_s20 }
  0x36   : > { %p3714_p2 = pneg %p3713_p1  ;;  %p3720_p6 = por %p3719_p4, %p3718_p3 }
  0x38   : > { %p3721_p8 = pnand %p3720_p6, %p3714_p2 }
  0x3a   : > { %3724 = shalt.err (!%p3721_p8)
}
  0x3b   : > { %s3968_s22 = smov 192   ;;  %s3969_s17 = smov 12  }
  0x3c   : > { %s4843_s28 = scalar_lea.sflag [#allocation8], %s4102_s26  ;;  %s3076_s14 = sshll.u32 %s4105_s27, 6 }
  0x3d   : > { %3457 = dma.hbm_to_vmem [thread:$0]  (!%p4108_p5), %s4116_s24, 3072, %s4118_s25, %s4843_s28, %s3968_s22, %s3968_s22, %s3969_s17  }
  0x3e   : > { %s3190_s23 = sshll.u32 %s3965_s21, 10  ;;  %s4844_s3 = sld [smem:[#allocation28_spill]] }
  0x3f   : > { %s513_s1 = scalar_lea.vmem [#allocation10], %s3076_s14  ;;  %s4817_s12 = scalar_lea.sflag [#allocation11], %s4102_s26 }
  0x40   : > { %s520_s13 = sshll.u32 %s513_s1, 4  ;;  %s4156_s13 = int_to_ptr.vmem [resolvable:$true] %s520_s13 }
  0x44   : > { %s4154_s16 = scalar_lea.hbm %s4844_s3, %s3190_s23  ;;  %s3730_s22 = scalar_lea.hbm %s4844_s3, 3072 }
  0x45   : > { %s3725_s11 = scalar_lea.hbm %s4154_s16, 1024  ;;  %p3731_p12 = scmp.lt.s32.totalorder %s4154_s16, %s4844_s3 }
  0x46   : > { %p3726_p9 = scmp.ne.s32.totalorder %s4154_s16, %s3725_s11  ;;  %p3732_p13 = scmp.lt.s32.totalorder %s3730_s22, %s3725_s11 }
  0x48   : > { %p3728_p10 = pnand %p3726_p9, %p4125_p7  ;;  %p3733_p0 = por %p3732_p13, %p3731_p12 }
  0x4a   : > { %p3729_p11 = pneg %p3728_p10 }
  0x4c   : > { %p3734_p1 = pnand %p3733_p0, %p3729_p11 }
  0x4e   : > { %3737 = shalt.err (!%p3734_p1)
}
  0x4f   : > { %s3738_s1 = scalar_lea.vmem %s4156_s13, 1024  ;;  %s3970_s14 = smov [#allocation10]  }
  0x50   : > { %p3739_p2 = scmp.ne.s32.totalorder %s4156_s13, %s3738_s1  ;;  %s3743_s23 = sshll.u32 %s3970_s14, 4  ;;  %s3744_s23 = int_to_ptr.vmem [resolvable:$false] %s3743_s23 }
  0x51   : > { %s3745_s30 = scalar_lea.vmem %s3744_s23, 2048  ;;  %p3746_p6 = scmp.lt.s32.totalorder %s4156_s13, %s3744_s23 }
  0x52   : > { %p3741_p3 = pnand %p3739_p2, %p4125_p7  ;;  %p3747_p8 = scmp.lt.s32.totalorder %s3745_s30, %s3738_s1 }
  0x54   : > { %p3742_p4 = pneg %p3741_p3  ;;  %p3748_p9 = por %p3747_p8, %p3746_p6 }
  0x56   : > { %p3749_p10 = pnand %p3748_p9, %p3742_p4 }
  0x58   : > { %3752 = shalt.err (!%p3749_p10)
}
  0x59   : > { %s4815_s11 = smov 64   ;;  %s4816_s20 = smov 4  }
  0x5a   : > { %3463 = dma.hbm_to_vmem [thread:$0]  (!%p4108_p5), %s4154_s16, 1024, %s4156_s13, %s4817_s12, %s4815_s11, %s4815_s11, %s4816_s20  }
  0x5b   : > { %s3080_s25 = sshll.u32 %s4105_s27, 7  ;;  %s3191_s24 = sshll.u32 %s3965_s21, 11 }
  0x5c   : > { %s4845_s7 = sld [smem:[#allocation30_spill]]  ;;  %s563_s1 = scalar_lea.vmem [#allocation13], %s3080_s25 }
  0x5d   : > { %s570_s14 = sshll.u32 %s563_s1, 4  ;;  %s4846_s9 = sld [smem:[#allocation32_spill]]  ;;  %s4193_s14 = int_to_ptr.vmem [resolvable:$true] %s570_s14 }
  0x5e   : > { %s4818_s13 = scalar_lea.sflag [#allocation14], %s4102_s26 }
  0x62   : > { %s4189_s28 = scalar_lea.hbm %s4845_s7, %s3191_s24  ;;  %s3758_s11 = scalar_lea.hbm %s4845_s7, 6144 }
  0x63   : > { %s4198_s3 = scalar_lea.hbm %s4846_s9, %s3191_s24  ;;  %s3753_s16 = scalar_lea.hbm %s4189_s28, 2048 }
  0x64   : > { %p3754_p11 = scmp.ne.s32.totalorder %s4189_s28, %s3753_s16  ;;  %p3759_p0 = scmp.lt.s32.totalorder %s4189_s28, %s4845_s7 }
  0x65   : > { %p3760_p1 = scmp.lt.s32.totalorder %s3758_s11, %s3753_s16 }
  0x66   : > { %p3756_p12 = pnand %p3754_p11, %p4125_p7 }
  0x67   : > { %p3761_p2 = por %p3760_p1, %p3759_p0 }
  0x68   : > { %p3757_p13 = pneg %p3756_p12 }
  0x6a   : > { %p3762_p3 = pnand %p3761_p2, %p3757_p13 }
  0x6c   : > { %3765 = shalt.err (!%p3762_p3)
}
  0x6d   : > { %s3766_s24 = scalar_lea.vmem %s4193_s14, 2048  ;;  %s3973_s1 = smov [#allocation13]  }
  0x6e   : > { %p3767_p4 = scmp.ne.s32.totalorder %s4193_s14, %s3766_s24  ;;  %s3771_s23 = sshll.u32 %s3973_s1, 4  ;;  %s3772_s23 = int_to_ptr.vmem [resolvable:$false] %s3771_s23 }
  0x6f   : > { %s3773_s30 = scalar_lea.vmem %s3772_s23, 4096  ;;  %p3774_p9 = scmp.lt.s32.totalorder %s4193_s14, %s3772_s23 }
  0x70   : > { %p3769_p6 = pnand %p3767_p4, %p4125_p7  ;;  %p3775_p10 = scmp.lt.s32.totalorder %s3773_s30, %s3766_s24 }
  0x72   : > { %p3770_p8 = pneg %p3769_p6  ;;  %p3776_p11 = por %p3775_p10, %p3774_p9 }
  0x74   : > { %p3777_p12 = pnand %p3776_p11, %p3770_p8 }
  0x76   : > { %3780 = shalt.err (!%p3777_p12)
}
  0x77   : > { %s4819_s12 = smov 128   ;;  %s4820_s11 = smov 8  }
  0x78   : > { %3469 = dma.hbm_to_vmem [thread:$0]  (!%p4108_p5), %s4189_s28, 2048, %s4193_s14, %s4818_s13, %s4819_s12, %s4819_s12, %s4820_s11  }
  0x79   : > { %s591_s20 = scalar_lea.vmem [#allocation15], %s3080_s25  ;;  %s4231_s22 = sadd.s32 4294967295, %s3965_s21  }
  0x7a   : > { %s598_s16 = sshll.u32 %s591_s20, 4  ;;  %p77_p13 = scmp.ne.s32.totalorder %s3957_s19, %s3953_s18  ;;  %s4228_s16 = int_to_ptr.vmem [resolvable:$true] %s598_s16 }
  0x7b   : > { %p4821_p0 = scmp.eq.s32.totalorder %s4231_s22, 0  ;;  %p3071_p1 = scmp.ge.s32.totalorder %s3965_s21, 1 }
  0x7c   : > { %p437_p2 = scmp.lt.s32.totalorder %s3965_s21, 4  ;;  %s3976_s14 = smov [#allocation4]  }
  0x7d   : > { %p4241_p4 = por %p4821_p0, %p77_p13  ;;  %s449_s17 = sshll.u32 %s3976_s14, 4  ;;  %s450_s17 = int_to_ptr.vmem [resolvable:$true] %s449_s17 }
  0x7e   : > { %p4245_p6 = pnand %p3071_p1, %p437_p2  ;;  %s3426_s24 = smul.u32 3, %s4105_s27 }
  0x7f   : > { %s4847_s28 = scalar_select %p4241_p4, 1, 0 }
  0x80   : > { %s4848_s25 = scalar_select %p4245_p6, 1, 0 }
  0x81   : > { %p3450_p8 = pneg %p4245_p6  ;;  %s3427_s18 = smul.u32 48, %s3965_s21 }
  0x82   : > { %s4850_s2 = sld [smem:[#allocation27_spill]]  ;;  %s494_s13 = scalar_lea.vmem [#allocation9], %s3426_s24 }
  0x83   : > { %p4255_p9 = pnand %p3450_p8, %p4821_p0  ;;  %s502_s12 = sshll.u32 %s494_s13, 4  ;;  %s4265_s12 = int_to_ptr.vmem [resolvable:$true] %s502_s12 }
  0x84   : > { %s3792_s14 = scalar_lea.vmem %s450_s17, 512  ;;  %p3800_p1 = scmp.lt.s32.totalorder %s450_s17, %s450_s17 }
  0x85   : > { %p3783_p10 = pneg %p4255_p9  ;;  %p3793_p11 = scmp.ne.s32.totalorder %s450_s17, %s3792_s14 }
  0x86   : > { %p3801_p2 = scmp.lt.s32.totalorder %s3792_s14, %s3792_s14 }
  0x87   : > { %p3795_p12 = pnand %p3793_p11, %p3783_p10 }
  0x88   : > { %s4262_s20 = scalar_lea.hbm %s4850_s2, %s3427_s18  ;;  %p3802_p8 = por %p3801_p2, %p3800_p1 }
  0x89   : > { %p3796_p13 = pneg %p3795_p12 }
  0x8b   : > { %p3803_p3 = pnand %p3802_p8, %p3796_p13 }
  0x8d   : > { %3806 = shalt.err (!%p3803_p3)
}
  0x8e   : > { %s4851_s18 = smov 8   ;;  %s4852_s23 = smov 128  }
  0x8f   : > { %s4853_s0 = sld [smem:[#allocation25_spill]]  ;;  %s3807_s30 = scalar_lea.hbm %s4262_s20, 48 }
  0x90   : > { %p3808_p10 = scmp.ne.s32.totalorder %s4262_s20, %s3807_s30  ;;  %s3812_s1 = scalar_lea.hbm %s4850_s2, 144 }
  0x91   : > { %p3813_p3 = scmp.lt.s32.totalorder %s4262_s20, %s4850_s2  ;;  %p3814_p13 = scmp.lt.s32.totalorder %s3812_s1, %s3807_s30 }
  0x92   : > { %p3810_p11 = pnand %p3808_p10, %p4125_p7 }
  0x93   : > { %p3815_p1 = por %p3814_p13, %p3813_p3 }
  0x94   : > { %p3811_p12 = pneg %p3810_p11 }
  0x95   : > { %3453 = dma.hbm_to_vmem [thread:$0]  (!%p4255_p9), %s4853_s0, 512, %s450_s17, [#allocation5], %s4852_s23, %s4852_s23, %s4851_s18  }
  0x96   : > { %p3816_p2 = pnand %p3815_p1, %p3811_p12 }
  0x98   : > { %3819 = shalt.err (!%p3816_p2)
}
  0x99   : > { %s3820_s17 = scalar_lea.vmem %s4265_s12, 48  ;;  %s3977_s18 = smov [#allocation9]  }
  0x9a   : > { %p3821_p9 = scmp.ne.s32.totalorder %s4265_s12, %s3820_s17  ;;  %s3825_s11 = sshll.u32 %s3977_s18, 4  ;;  %s3826_s11 = int_to_ptr.vmem [resolvable:$false] %s3825_s11 }
  0x9b   : > { %s3827_s23 = scalar_lea.vmem %s3826_s11, 96  ;;  %p3828_p11 = scmp.lt.s32.totalorder %s4265_s12, %s3826_s11 }
  0x9c   : > { %p3823_p8 = pnand %p3821_p9, %p4125_p7  ;;  %p3829_p0 = scmp.lt.s32.totalorder %s3827_s23, %s3820_s17 }
  0x9e   : > { %p3824_p10 = pneg %p3823_p8  ;;  %p3830_p4 = por %p3829_p0, %p3828_p11 }
  0xa0   : > { %p3831_p6 = pnand %p3830_p4, %p3824_p10 }
  0xa2   : > { %3834 = shalt.err (!%p3831_p6)
}
  0xa3   : > { %s4854_s7 = scalar_lea.sflag [#allocation8], %s4102_s26  ;;  %s4855_s8 = sshll.u32 %s3965_s21, 4 }
  0xa4   : > { %3460 = dma.hbm_to_vmem [thread:$0]  (!%p4108_p5), %s4262_s20, 48, %s4265_s12, %s4854_s7  }
  0xa5   : > { %s4856_s6 = sld [smem:[#allocation29_spill]]  ;;  %s545_s14 = scalar_lea.vmem [#allocation12], %s4105_s27 }
  0xa6   : > { %s552_s1 = sshll.u32 %s545_s14, 4  ;;  %s553_s1 = int_to_ptr.vmem [resolvable:$true] %s552_s1 }
  0xab   : > { %s550_s30 = scalar_lea.hbm %s4856_s6, %s4855_s8  ;;  %s3840_s23 = scalar_lea.hbm %s4856_s6, 48 }
  0xac   : > { %s3835_s17 = scalar_lea.hbm %s550_s30, 16  ;;  %p3841_p12 = scmp.lt.s32.totalorder %s550_s30, %s4856_s6 }
  0xad   : > { %p3836_p0 = scmp.ne.s32.totalorder %s550_s30, %s3835_s17  ;;  %p3842_p3 = scmp.lt.s32.totalorder %s3840_s23, %s3835_s17 }
  0xaf   : > { %p3838_p4 = pnand %p3836_p0, %p4125_p7  ;;  %p3843_p13 = por %p3842_p3, %p3841_p12 }
  0xb1   : > { %p3839_p6 = pneg %p3838_p4 }
  0xb3   : > { %p3844_p1 = pnand %p3843_p13, %p3839_p6 }
  0xb5   : > { %3847 = shalt.err (!%p3844_p1)
}
  0xb6   : > { %s3848_s21 = scalar_lea.vmem %s553_s1, 16  ;;  %s3978_s27 = smov [#allocation12]  }
  0xb7   : > { %p3849_p2 = scmp.ne.s32.totalorder %s553_s1, %s3848_s21  ;;  %s3853_s12 = sshll.u32 %s3978_s27, 4  ;;  %s3854_s12 = int_to_ptr.vmem [resolvable:$false] %s3853_s12 }
  0xb8   : > { %s3855_s20 = scalar_lea.vmem %s3854_s12, 32  ;;  %p3856_p10 = scmp.lt.s32.totalorder %s553_s1, %s3854_s12 }
  0xb9   : > { %p3851_p9 = pnand %p3849_p2, %p4125_p7  ;;  %p3857_p11 = scmp.lt.s32.totalorder %s3855_s20, %s3848_s21 }
  0xbb   : > { %p3852_p8 = pneg %p3851_p9  ;;  %p3858_p0 = por %p3857_p11, %p3856_p10 }
  0xbd   : > { %p3859_p4 = pnand %p3858_p0, %p3852_p8 }
  0xbf   : > { %3862 = shalt.err (!%p3859_p4)
}
  0xc0   : > { %s4857_s0 = scalar_lea.sflag [#allocation11], %s4102_s26  ;;  %s3863_s2 = scalar_lea.hbm %s4198_s3, 2048 }
  0xc1   : > { %3466 = dma.hbm_to_vmem [thread:$0]  (!%p4108_p5), %s550_s30, 16, %s553_s1, %s4857_s0  }
  0xc2   : > { %p3864_p6 = scmp.ne.s32.totalorder %s4198_s3, %s3863_s2  ;;  %s3868_s13 = scalar_lea.hbm %s4846_s9, 6144 }
  0xc3   : > { %p3869_p13 = scmp.lt.s32.totalorder %s4198_s3, %s4846_s9  ;;  %p3870_p1 = scmp.lt.s32.totalorder %s3868_s13, %s3863_s2 }
  0xc4   : > { %p3866_p12 = pnand %p3864_p6, %p4125_p7 }
  0xc5   : > { %p3871_p2 = por %p3870_p1, %p3869_p13 }
  0xc6   : > { %p3867_p3 = pneg %p3866_p12 }
  0xc8   : > { %p3872_p9 = pnand %p3871_p2, %p3867_p3 }
  0xca   : > { %3875 = shalt.err (!%p3872_p9)
}
  0xcb   : > { %s3876_s30 = scalar_lea.vmem %s4228_s16, 2048  ;;  %s3979_s1 = smov [#allocation15]  }
  0xcc   : > { %p3877_p8 = scmp.ne.s32.totalorder %s4228_s16, %s3876_s30  ;;  %s3881_s17 = sshll.u32 %s3979_s1, 4  ;;  %s3882_s17 = int_to_ptr.vmem [resolvable:$false] %s3881_s17 }
  0xcd   : > { %s3883_s18 = scalar_lea.vmem %s3882_s17, 4096  ;;  %p3884_p0 = scmp.lt.s32.totalorder %s4228_s16, %s3882_s17 }
  0xce   : > { %p3879_p10 = pnand %p3877_p8, %p4125_p7  ;;  %p3885_p4 = scmp.lt.s32.totalorder %s3883_s18, %s3876_s30 }
  0xd0   : > { %p3880_p11 = pneg %p3879_p10  ;;  %p3886_p6 = por %p3885_p4, %p3884_p0 }
  0xd2   : > { %p3887_p12 = pnand %p3886_p6, %p3880_p11 }
  0xd4   : > { %3890 = shalt.err (!%p3887_p12)
}
  0xd5   : > { %s4858_s11 = smov 4   ;;  %s4859_s23 = smov 64  }
  0xd6   : > { %s4860_s21 = scalar_lea.sflag [#allocation14], %s4102_s26  ;;  %p4861_p7 = scmp.ne.s32.totalorder %s4848_s25, 0 }
  0xd7   : > { %3472 = dma.hbm_to_vmem [thread:$0]  (!%p4108_p5), %s4198_s3, 2048, %s4228_s16, %s4860_s21, %s4859_s23, %s4859_s23, %s4858_s11  }
  0xd8   : > { %628 = sbr.rel (%p4861_p7) target bundleno = 4551 (0x11c7), region = 80  ;;  %p4862_p3 = scmp.eq.s32.totalorder (!%p4861_p7), %s4231_s22, 0 }
  0xdd   : > { %3932 = dma.done.wait (%p4862_p3), [#allocation5], 512   ;;  %p4863_p13 = pmov %p4862_p3 }
  0xde   : > { %s634_s15 = sand.u32 1, %s4231_s22   ;;  %s4352_s29 = sand.u32 1, %s3957_s19  }
  0xdf   : > { %3934 = vsyncadd (%p4863_p13), [#allocation5], 4294966784  ;;  %s3428_s26 = smul.u32 192, %s4352_s29  ;;  %s635_s27 = scalar_lea.sflag [#allocation8], %s634_s15 }
  0xe0   : > { %p4864_p5 = scmp.ne.s32.totalorder %s4847_s28, 0 }
  0xe1   : > { %s4355_s12 = scalar_lea.vmem [#allocation7], %s3428_s26 }
  0xe2   : > { %3936 = dma.done.wait (%p4864_p5), %s635_s27, 3120  }
  0xe3   : > { %3938 = vsyncadd (%p4864_p5), %s635_s27, 4294964176  ;;  %s3429_s3 = smul.u32 3, %s4352_s29  ;;  %s3088_s16 = sshll.u32 %s4352_s29, 6 }
  0xe4   : > { %s653_s20 = scalar_lea.sflag [#allocation11], %s634_s15  ;;  %s4365_s0 = scalar_lea.vmem [#allocation10], %s3088_s16 }
  0xe5   : > { %s4363_s25 = scalar_lea.vmem [#allocation9], %s3429_s3 }
  0xe6   : > { %3940 = dma.done.wait (%p4864_p5), %s653_s20, 1040  }
  0xe7   : > { %3942 = vsyncadd (%p4864_p5), %s653_s20, 4294966256  ;;  %s3089_s2 = sshll.u32 %s4352_s29, 7  ;;  %s670_s8 = scalar_lea.sflag [#allocation14], %s634_s15 }
  0xe8   : > { %s4373_s13 = scalar_lea.vmem [#allocation13], %s3089_s2 }
  0xe9   : > { %3944 = dma.done.wait (%p4864_p5), %s670_s8, 4096  }
  0xea   : > { %3946 = vsyncadd (%p4864_p5), %s670_s8, 4294963200  ;;  %p767_p1 = scmp.lt.s32.totalorder %s4231_s22, 2  ;;  %s4865_s3 = sld [smem:[#allocation31_spill]] }
  0xeb   : > { %s4866_s14 = sld [smem:[#allocation33_spill]]  ;;  %s4409_s17 = scalar_lea.vmem [#allocation15], %s3089_s2 }
  0xec   : > { %s4381_s24 = scalar_select %p767_p1, %s4231_s22, 2 }
  0xed   : > { %s4867_s6 = sld [smem:[#allocation34_spill]]  ;;  %p4868_p2 = scmp.ne.s32.totalorder %s4231_s22, 0 }
  0xee   : > { %s772_s28 = scalar_lea.vmem %s4801_s5, %s4381_s24  ;;  %s3091_s11 = sshll.u32 %s4381_s24, 1 }
  0xef   : > { %s779_s15 = scalar_lea.vmem %s4806_s10, %s4381_s24  ;;  %790 = sbr.rel (%p4868_p2) target bundleno = 247 (0xf7), region = 112 }
  0xf0   : > { %s4399_s16 = scalar_lea.vmem %s4865_s3, %s3091_s11 }
  0xf1   : > { %s782_s30 = scalar_lea.vmem %s4866_s14, %s4381_s24 }
  0xf3   : > { %s785_s9 = scalar_lea.vmem %s4867_s6, %s4381_s24 }
  0xf4   : > { %v791_v0 = vld [vmem:[#allocation4] sm:$0xff]  ;;  %v792_v1 = vld [vmem:[#allocation4 + $0x8] sm:$0xff]  ;;  %v793_v2 = vld [vmem:[#allocation4 + $0x10] sm:$0xff] }
  0xf5   : > { %795 = vst [vmem:[#allocation2 + $0x10] sm:$0xff] %v791_v0  ;;  %796 = vst [vmem:[#allocation2] sm:$0xff] %v792_v1  ;;  %v794_v3 = vld [vmem:[#allocation4 + $0x18] sm:$0xff] }
  0xf6   : > { %797 = vst [vmem:[#allocation2 + $0x18] sm:$0xff] %v793_v2  ;;  %798 = vst [vmem:[#allocation2 + $0x8] sm:$0xff] %v794_v3 }
  0xf7 PF: > { %v3525_v4 = vld [vmem:[%s4355_s12 + $0xac] ss:$12 sps:$4 sm:$0xff]   ;;  %v3527_v5 = vld [vmem:[%s4355_s12 + $0xa8] ss:$12 sps:$4 sm:$0xff]   ;;  %v3980_v6 = vmov 0   ;;  %v3981_v27 = vmov 0.0   ;;  %v839_v28 = vlaneseq  ;;  %s4869_s7 = scalar_lea.vmem %s4800_s4, %s4381_s24 }
  0xf8   : > { %1014 = vmatprep.mubr.bf16.mxu0 %v3980_v6  ;;  %982 = vmatprep.subr.bf16.mxu0 %v3525_v4  ;;  %v3528_v7 = vld [vmem:[%s4355_s12 + $0x94] ss:$12 sps:$4 sm:$0xff]   ;;  %v3530_v8 = vld [vmem:[%s4355_s12 + $0x90] ss:$12 sps:$4 sm:$0xff]   ;;  %v3533_v10 = vld [vmem:[%s4355_s12 + $0x78] ss:$12 sps:$4 sm:$0xff]  }
  0xf9   : > { %983 = vmatpush1.bf16.msra.mxu0 %v3527_v5  ;;  %v3531_v9 = vld [vmem:[%s4355_s12 + $0x7c] ss:$12 sps:$4 sm:$0xff]   ;;  %v3534_v11 = vld [vmem:[%s4355_s12 + $0x64] ss:$12 sps:$4 sm:$0xff]   ;;  %v3536_v13 = vld [vmem:[%s4355_s12 + $0x60] ss:$12 sps:$4 sm:$0xff]  }
  0xfa   : > { %984 = vmatprep.subr.bf16.mxu0 %v3528_v7  ;;  %v3537_v15 = vld [vmem:[%s4355_s12 + $0x4c] ss:$12 sps:$4 sm:$0xff]   ;;  %v3539_v17 = vld [vmem:[%s4355_s12 + $0x48] ss:$12 sps:$4 sm:$0xff]   ;;  %v3542_v19 = vld [vmem:[%s4355_s12 + $0x30] ss:$12 sps:$4 sm:$0xff]  }
  0xfb   : > { %v3540_v18 = vld [vmem:[%s4355_s12 + $0x34] ss:$12 sps:$4 sm:$0xff]   ;;  %v3543_v20 = vld [vmem:[%s4355_s12 + $0x1c] ss:$12 sps:$4 sm:$0xff]   ;;  %v3545_v21 = vld [vmem:[%s4355_s12 + $0x18] ss:$12 sps:$4 sm:$0xff]  }
  0xfc   : > { %v799_v12 = vld [vmem:[#allocation2 + $0x10] sm:$0xff]  ;;  %v800_v14 = vld [vmem:[#allocation2] sm:$0xff]  ;;  %vm3982_vm0 = vmmov 0   ;;  %v4437_v29 = vshrl.u32 %v839_v28, 7  ;;  %vm1090_vm1 = vcmask 261120   ;;  %vm1185_vm2 = vcmask 130048  }
  0xfd   : > { %985 = vmatpush1.bf16.msra.mxu0 %v3530_v8  ;;  %v803_v16 = vpack.c.bf16 %v800_v14, %v799_v12  ;;  %v3546_v22 = vld [vmem:[%s4355_s12 + $0x4] ss:$12 sps:$4 sm:$0xff]   ;;  %v3548_v23 = vld [vmem:[%s4355_s12] ss:$12 sps:$4 sm:$0xff]   ;;  %v801_v24 = vld [vmem:[#allocation2 + $0x18] sm:$0xff]  ;;  %s3983_s6 = smov 96  }
  0xfe   : > { %986 = vmatprep.subr.bf16.mxu0 %v3531_v9  ;;  %v802_v25 = vld [vmem:[#allocation2 + $0x8] sm:$0xff]  ;;  %v845_v30 = vsub.s32 1, %v4437_v29  ;;  %v4441_v32 = vld [vmem:[%s4363_s25] sm:$0x7]  ;;  %v841_v37 = vsub.s32 0, %v4437_v29  ;;  %s3985_s25 = smov 32  }
  0xff   : > { %3304 = vmatprep.mubr.bf16.mxu1 %v803_v16  ;;  %v4431_v26 = vpack.c.bf16 %v802_v25, %v801_v24  ;;  %v3549_v57 = vld [vmem:[%s4355_s12 + $0xb0] ss:$12 sps:$4 sm:$0xff]   ;;  %v3550_v58 = vld [vmem:[%s4355_s12 + $0x98] ss:$12 sps:$4 sm:$0xff]   ;;  %v3551_v59 = vld [vmem:[%s4355_s12 + $0x80] ss:$12 sps:$4 sm:$0xff]  }
 0x100   : > { %v846_v34 = vrot.slane %v4441_v32, %v845_v30  ;;  %v842_v43 = vrot.slane %v4441_v32, %v841_v37  ;;  %3288 = vmatprep.subr.bf16.mxu1 %v3549_v57  ;;  %v3552_v60 = vld [vmem:[%s4355_s12 + $0x68] ss:$12 sps:$4 sm:$0xff]   ;;  %v3553_v61 = vld [vmem:[%s4355_s12 + $0x50] ss:$12 sps:$4 sm:$0xff]   ;;  %v3554_v62 = vld [vmem:[%s4355_s12 + $0x38] ss:$12 sps:$4 sm:$0xff]  }
 0x101   : > { %987 = vmatpush1.bf16.msra.mxu0 %v3533_v10  ;;  %3289 = vmatpush3.bf16.msra.mxu1 %v3549_v57  ;;  %v3555_v63 = vld [vmem:[%s4355_s12 + $0x20] ss:$12 sps:$4 sm:$0xff]   ;;  %v3556_v0 = vld [vmem:[%s4355_s12 + $0x8] ss:$12 sps:$4 sm:$0xff]   ;;  %s3984_s12 = smov 64   ;;  %vm1588_vm3 = vcmask 523520  }
 0x102   : > { %988 = vmatprep.subr.bf16.mxu0 %v3534_v11  ;;  %3290 = vmatprep.subr.bf16.mxu1 %v3550_v58  ;;  %vm1851_vm4 = vcmask 785920   ;;  %vm2114_vm5 = vcmask 1048320   ;;  %s4870_s18 = scalar_lea.vmem [#allocation12], %s4352_s29  ;;  %p3179_p9 = scmp.ne.s32.totalorder %s4231_s22, 2 }
 0x103   : > { %s4873_s3 = sld [smem:[#allocation35_spill]] (!%p3179_p9) }
 0x104   : > { %s4874_s8 = sld [smem:[#allocation36_spill]] (!%p3179_p9) }
 0x105   : > { %989 = vmatpush1.bf16.msra.mxu0 %v3536_v13  ;;  %3291 = vmatpush3.bf16.msra.mxu1 %v3550_v58 }
 0x106   : > { %990 = vmatprep.subr.bf16.mxu0 %v3537_v15  ;;  %3292 = vmatprep.subr.bf16.mxu1 %v3551_v59 }
 0x109   : > { %991 = vmatpush1.bf16.msra.mxu0 %v3539_v17  ;;  %3293 = vmatpush3.bf16.msra.mxu1 %v3551_v59 }
 0x10a   : > { %992 = vmatprep.subr.bf16.mxu0 %v3540_v18  ;;  %3294 = vmatprep.subr.bf16.mxu1 %v3552_v60 }
 0x10d   : > { %993 = vmatpush1.bf16.msra.mxu0 %v3542_v19  ;;  %3295 = vmatpush3.bf16.msra.mxu1 %v3552_v60 }
 0x10e   : > { %994 = vmatprep.subr.bf16.mxu0 %v3543_v20  ;;  %3296 = vmatprep.subr.bf16.mxu1 %v3553_v61 }
 0x111   : > { %995 = vmatpush1.bf16.msra.mxu0 %v3545_v21  ;;  %3297 = vmatpush3.bf16.msra.mxu1 %v3553_v61 }
 0x112   : > { %996 = vmatprep.subr.bf16.mxu0 %v3546_v22  ;;  %3298 = vmatprep.subr.bf16.mxu1 %v3554_v62 }
 0x115   : > { %997 = vmatpush1.bf16.msra.mxu0 %v3548_v23  ;;  %3299 = vmatpush3.bf16.msra.mxu1 %v3554_v62 }
 0x116   : > { %3308 = vmatprep.subr.bf16.mxu0 %v3981_v27  ;;  %3300 = vmatprep.subr.bf16.mxu1 %v3555_v63 }
 0x118   : > { %1015 = vmatmul.mubr.bf16.vlgmr.msra.gmra.mxu0 %v803_v16 }
 0x119   : > { %1024 = vmatprep.mubr.bf16.mxu0 %v3980_v6  ;;  %3301 = vmatpush3.bf16.msra.mxu1 %v3555_v63 }
 0x11a   : > { %3302 = vmatprep.subr.bf16.mxu1 %v3556_v0 }
 0x11d   : > { %3303 = vmatpush3.bf16.msra.mxu1 %v3556_v0 }
 0x11e   : > { %3320 = vmatprep.subr.bf16.mxu1 %v3981_v27 }
 0x120   : > { %1025 = vmatmul.mubr.bf16.gmra.mxu0 %v4431_v26  ;;  %3305 = vmatmul.mubr.bf16.vlgmr.msra.gmra.mxu1 %v4431_v26 }
 0x121   : > { %3310 = vmatprep.mubr.msk.bf16.mxu0 %vm3982_vm0, %v3981_v27  ;;  %3322 = vmatprep.mubr.msk.bf16.mxu1 %vm3982_vm0, %v3981_v27 }
 0x1d8   : > { %v1016_v31 = vpop.f32.mrf.mxu0 }
 0x1d9   : > { %v1017_v49 = vadd.f32 %v1016_v31, %v842_v43 }
 0x1da   : > { %v1018_v33 = vpop.f32.mrf.mxu0 }
 0x1db   : > { %v1019_v38 = vadd.f32 %v1018_v33, %v846_v34  ;;  %v849_v33 = vsub.s32 2, %v4437_v29 }
 0x1dc   : > { %v1020_v35 = vpop.f32.mrf.mxu0 }
 0x1dd   : > { %v1021_v46 = vadd.f32 %v1020_v35, %v842_v43  ;;  %v850_v35 = vrot.slane %v4441_v32, %v849_v33 }
 0x1de   : > { %v1022_v36 = vpop.f32.mrf.mxu0 }
 0x1df   : > { %v1023_v39 = vadd.f32 %v1022_v36, %v846_v34  ;;  %v4455_v51 = vpack.c.bf16 %v1021_v46, %v1017_v49 }
 0x1e0   : > { %v1026_v40 = vpop.f32.mrf.mxu0 }
 0x1e1   : > { %v4447_v41 = vpack.c.bf16 %v1023_v39, %v1019_v38  ;;  %v1027_v53 = vadd.f32 %v1026_v40, %v842_v43 }
 0x1e2   : > { %v1028_v42 = vpop.f32.mrf.mxu0 }
 0x1e3   : > { %v1095_v44 = vsel %vm1090_vm1, %v4447_v41, 0  ;;  %v1029_v47 = vadd.f32 %v1028_v42, %v846_v34 }
 0x1e4   : > { %v1030_v45 = vpop.f32.mrf.mxu0  ;;  %3309 = vmatpush3.bf16.xpose.msra.mxu0 %v1095_v44 }
 0x1e5   : > { %3314 = vmatprep.subr.bf16.mxu0 %v3981_v27  ;;  %v1031_v54 = vadd.f32 %v1030_v45, %v842_v43 }
 0x1e6   : > { %v1032_v48 = vpop.f32.mrf.mxu0 }
 0x1e7   : > { %v1033_v50 = vadd.f32 %v1032_v48, %v846_v34  ;;  %v4466_v56 = vpack.c.bf16 %v1031_v54, %v1027_v53  ;;  %v3306_v34 = vpop.f32.mrf.mxu1 }
 0x1e8   : > { %v1078_v38 = vadd.f32 %v3306_v34, %v850_v35 }
 0x1e9   : > { %v4457_v52 = vpack.c.bf16 %v1033_v50, %v1029_v47  ;;  %v1069_v36 = vpop.f32.mrf.mxu1 }
 0x1ea   : > { %v1070_v40 = vadd.f32 %v1069_v36, %v850_v35 }
 0x1eb   : > { %3311 = vmatmul.mubr.msk.bf16.vlgmr.msra.gmra.mxu0 %vm1090_vm1, %v4455_v51  ;;  %v1142_v55 = vsel %vm1090_vm1, %v4457_v52, 0  ;;  %v3307_v39 = vpop.f32.mrf.mxu1 }
 0x1ec   : > { %3315 = vmatpush3.bf16.xpose.msra.mxu0 %v1142_v55  ;;  %3316 = vmatprep.mubr.msk.bf16.mxu0 %vm3982_vm0, %v3981_v27  ;;  %v1081_v42 = vadd.f32 %v3307_v39, %v850_v35 }
 0x1ed   : > { %3326 = vmatprep.subr.bf16.mxu0 %v3981_v27  ;;  %v1072_v43 = vpop.f32.mrf.mxu1 }
 0x1ee   : > { %v4495_v44 = vpack.c.bf16 %v1081_v42, %v1078_v38  ;;  %v1073_v45 = vadd.f32 %v1072_v43, %v850_v35 }
 0x1f0   : > { %v4497_v46 = vpack.c.bf16 %v1073_v45, %v1070_v40 }
 0x1f2   : > { %3321 = vmatpush3.bf16.msra.mxu1 %v4497_v46 }
 0x1f3   : > { %3317 = vmatmul.mubr.msk.bf16.vlgmr.msra.gmra.mxu0 %vm1090_vm1, %v4466_v56  ;;  %3332 = vmatprep.subr.bf16.mxu1 %v3981_v27 }
 0x1f4   : > { %3328 = vmatprep.mubr.msk.bf16.mxu0 %vm3982_vm0, %v3981_v27  ;;  %3327 = vmatpush3.bf16.msra.mxu0 %v4495_v44 }
 0x1f5   : > { %3338 = vmatprep.subr.bf16.mxu0 %v3981_v27 }
 0x2ab   : > { %v1131_v1 = vpop.f32.mrf.mxu0 }
 0x2ac   : > { %v1186_v2 = vsel %vm1185_vm2, %v1131_v1, -inf }
 0x2ad   : > { %1187 = vmax.xlane.f32.xlu0 %v1186_v2  ;;  %v3312_v3 = vpop.f32.mrf.mxu0 }
 0x2af   : > { %v1134_v4 = vpop.f32.mrf.mxu0 }
 0x2b0   : > { %v1189_v5 = vsel %vm1185_vm2, %v1134_v4, -inf }
 0x2b1   : > { %1190 = vmax.xlane.f32.xlu0 %v1189_v5  ;;  %v3313_v7 = vpop.f32.mrf.mxu0 }
 0x2b3   : > { %v1178_v8 = vpop.f32.mrf.mxu0 }
 0x2b4   : > { %v1192_v9 = vsel %vm1185_vm2, %v1178_v8, -inf }
 0x2b5   : > { %1193 = vmax.xlane.f32.xlu1 %v1192_v9  ;;  %v3318_v10 = vpop.f32.mrf.mxu0 }
 0x2b7   : > { %v1181_v11 = vpop.f32.mrf.mxu0 }
 0x2b8   : > { %v1195_v12 = vsel %vm1185_vm2, %v1181_v11, -inf }
 0x2b9   : > { %1196 = vmax.xlane.f32.xlu1 %v1195_v12  ;;  %v3319_v13 = vpop.f32.mrf.mxu0 }
 0x336   : > { %v1188_v14 = vpop.xlane.xlu0 %1187 }
 0x337   : > { %v1198_v15 = vsub.f32 %v1131_v1, %v1188_v14 }
 0x339   : > { %v1202_v16 = vmul.f32 1.442695, %v1198_v15 }
 0x33a   : > { %v1191_v17 = vpop.xlane.xlu0 %1190 }
 0x33b   : > { %3605 = vpow2.f32 %v1202_v16  ;;  %v1199_v18 = vsub.f32 %v1134_v4, %v1191_v17 }
 0x33d   : > { %v1204_v19 = vmul.f32 1.442695, %v1199_v18 }
 0x33e   : > { %v1194_v20 = vpop.xlane.xlu1 %1193 }
 0x33f   : > { %3607 = vpow2.f32 %v1204_v19  ;;  %v1200_v21 = vsub.f32 %v1178_v8, %v1194_v20 }
 0x341   : > { %v1206_v22 = vmul.f32 1.442695, %v1200_v21 }
 0x342   : > { %v1197_v32 = vpop.xlane.xlu1 %1196 }
 0x343   : > { %3609 = vpow2.f32 %v1206_v22  ;;  %v1201_v47 = vsub.f32 %v1181_v11, %v1197_v32 }
 0x345   : > { %v1208_v48 = vmul.f32 1.442695, %v1201_v47 }
 0x347   : > { %3611 = vpow2.f32 %v1208_v48 }
 0x348   : > { %v3606_v23 = vpop.eup %3605 }
 0x349   : > { %v1210_v24 = vsel %vm1185_vm2, %v3606_v23, 0.0 }
 0x34a   : > { %1211 = vadd.xlane.f32.xlu0 %v1210_v24 }
 0x34c   : > { %v3608_v25 = vpop.eup %3607 }
 0x34d   : > { %v1213_v26 = vsel %vm1185_vm2, %v3608_v25, 0.0 }
 0x34e   : > { %1214 = vadd.xlane.f32.xlu1 %v1213_v26 }
 0x350   : > { %v3610_v28 = vpop.eup %3609 }
 0x351   : > { %v1216_v31 = vsel %vm1185_vm2, %v3610_v28, 0.0 }
 0x352   : > { %1217 = vadd.xlane.f32.xlu0 %v1216_v31 }
 0x354   : > { %v3612_v49 = vpop.eup %3611 }
 0x355   : > { %v1219_v50 = vsel %vm1185_vm2, %v3612_v49, 0.0 }
 0x35f   : > { %1381 = vrot.lane.b32.xlu1 %v4457_v52, %s3983_s6 }
 0x368   : > { %1328 = vrot.lane.b32.xlu0 %v4447_v41, %s3983_s6 }
 0x383   : > { %1220 = vadd.xlane.f32.xlu1 %v1219_v50 }
 0x394   : > { %1325 = vrot.lane.b32.xlu1 %v4455_v51, %s3983_s6 }
 0x398   : > { %1378 = vrot.lane.b32.xlu1 %v4466_v56, %s3983_s6 }
 0x3d3   : > { %v1212_v53 = vpop.xlane.xlu0 %1211 }
 0x3d4   : > { %3613 = vrcp.f32 %v1212_v53 }
 0x3d7   : > { %v1215_v54 = vpop.xlane.xlu1 %1214 }
 0x3d8   : > { %3615 = vrcp.f32 %v1215_v54 }
 0x3db   : > { %v1218_v55 = vpop.xlane.xlu0 %1217  ;;  %v1382_v0 = vpop.permute.xlu1 %1381 }
 0x3dc   : > { %3617 = vrcp.f32 %v1218_v55  ;;  %v1387_v9 = vsel %vm1090_vm1, %v1382_v0, 0 }
 0x3df   : > { %v1329_v61 = vpop.permute.xlu0 %1328 }
 0x3e0   : > { %v1334_v63 = vsel %vm1090_vm1, %v1329_v61, 0 }
 0x3e1   : > { %v3614_v57 = vpop.eup %3613 }
 0x3e2   : > { %v1226_v59 = vmul.f32 %v3614_v57, %v3606_v23 }
 0x3e5   : > { %v3616_v58 = vpop.eup %3615 }
 0x3e6   : > { %v1227_v60 = vmul.f32 %v3616_v58, %v3608_v25 }
 0x3e8   : > { %v1230_v62 = vpack.c.bf16 %v1227_v60, %v1226_v59 }
 0x3e9   : > { %v3618_v3 = vpop.eup %3617 }
 0x3ea   : > { %3323 = vmatmul.mubr.msk.bf16.vlgmr.msra.gmra.mxu1 %vm1185_vm2, %v1230_v62  ;;  %v1228_v5 = vmul.f32 %v3618_v3, %v3610_v28 }
 0x3eb   : > { %3333 = vmatpush3.bf16.xpose.msra.mxu1 %v1334_v63  ;;  %3334 = vmatprep.mubr.msk.bf16.mxu1 %vm3982_vm0, %v3981_v27 }
 0x3ec   : > { %3344 = vmatprep.subr.bf16.mxu1 %v3981_v27 }
 0x40c   : > { %v1221_v1 = vpop.xlane.xlu1 %1220 }
 0x40d   : > { %3619 = vrcp.f32 %v1221_v1 }
 0x410   : > { %v1326_v2 = vpop.permute.xlu1 %1325 }
 0x411   : > { %3335 = vmatmul.mubr.msk.bf16.vlgmr.msra.gmra.mxu1 %vm1090_vm1, %v1326_v2 }
 0x412   : > { %3346 = vmatprep.mubr.msk.bf16.mxu1 %vm3982_vm0, %v3981_v27 }
 0x414   : > { %v1379_v10 = vpop.permute.xlu1 %1378 }
 0x41a   : > { %v3620_v4 = vpop.eup %3619 }
 0x41b   : > { %v1229_v7 = vmul.f32 %v3620_v4, %v3612_v49 }
 0x41d   : > { %v1231_v8 = vpack.c.bf16 %v1229_v7, %v1228_v5 }
 0x41f   : > { %3329 = vmatmul.mubr.msk.bf16.vlgmr.msra.gmra.mxu0 %vm1185_vm2, %v1231_v8 }
 0x420   : > { %3339 = vmatpush3.bf16.xpose.msra.mxu0 %v1387_v9  ;;  %3340 = vmatprep.mubr.msk.bf16.mxu0 %vm3982_vm0, %v3981_v27 }
 0x421   : > { %3350 = vmatprep.subr.bf16.mxu0 %v3981_v27 }
 0x427   : > { %3341 = vmatmul.mubr.msk.bf16.vlgmr.msra.gmra.mxu0 %vm1090_vm1, %v1379_v10 }
 0x428   : > { %3352 = vmatprep.mubr.msk.bf16.mxu0 %vm3982_vm0, %v3981_v27 }
 0x4aa   : > { %v1269_v11 = vpop.f32.mrf.mxu1 }
 0x4ab   : > { %1320 = vst.msk [vmem:[#allocation3] sm:$0xff] %vm1090_vm1, %v1269_v11 }
 0x4ac   : > { %v3324_v12 = vpop.f32.mrf.mxu1 }
 0x4ae   : > { %v1272_v13 = vpop.f32.mrf.mxu1 }
 0x4af   : > { %1321 = vst.msk [vmem:[#allocation3 + $0x8] sm:$0xff] %vm1090_vm1, %v1272_v13 }
 0x4b0   : > { %v3325_v14 = vpop.f32.mrf.mxu1 }
 0x4d1   : > { %v1370_v15 = vpop.f32.mrf.mxu1 }
 0x4d2   : > { %v1430_v16 = vsel %vm1185_vm2, %v1370_v15, -inf }
 0x4d3   : > { %1431 = vmax.xlane.f32.xlu0 %v1430_v16  ;;  %v3336_v17 = vpop.f32.mrf.mxu1 }
 0x4d5   : > { %v1373_v18 = vpop.f32.mrf.mxu1 }
 0x4d6   : > { %v1433_v19 = vsel %vm1185_vm2, %v1373_v18, -inf }
 0x4d7   : > { %1434 = vmax.xlane.f32.xlu1 %v1433_v19  ;;  %v3337_v20 = vpop.f32.mrf.mxu1 }
 0x4df   : > { %v1313_v21 = vpop.f32.mrf.mxu0 }
 0x4e0   : > { %1322 = vst.msk [vmem:[#allocation3 + $0x10] sm:$0xff] %vm1090_vm1, %v1313_v21 }
 0x4e1   : > { %v3330_v22 = vpop.f32.mrf.mxu0 }
 0x4e3   : > { %v1316_v23 = vpop.f32.mrf.mxu0 }
 0x4e4   : > { %1323 = vst.msk [vmem:[#allocation3 + $0x18] sm:$0xff] %vm1090_vm1, %v1316_v23 }
 0x4e5   : > { %v3331_v24 = vpop.f32.mrf.mxu0 }
 0x4e7   : > { %v1423_v25 = vpop.f32.mrf.mxu0 }
 0x4e8   : > { %v1436_v26 = vsel %vm1185_vm2, %v1423_v25, -inf }
 0x4e9   : > { %1437 = vmax.xlane.f32.xlu0 %v1436_v26  ;;  %v3342_v28 = vpop.f32.mrf.mxu0 }
 0x4eb   : > { %v1426_v31 = vpop.f32.mrf.mxu0 }
 0x4ec   : > { %v1439_v33 = vsel %vm1185_vm2, %v1426_v31, -inf }
 0x4ed   : > { %1440 = vmax.xlane.f32.xlu0 %v1439_v33  ;;  %v3343_v34 = vpop.f32.mrf.mxu0 }
 0x55c   : > { %v1432_v35 = vpop.xlane.xlu0 %1431 }
 0x55d   : > { %v1442_v36 = vsub.f32 %v1370_v15, %v1432_v35 }
 0x55f   : > { %v1446_v38 = vmul.f32 1.442695, %v1442_v36 }
 0x560   : > { %v1435_v39 = vpop.xlane.xlu1 %1434 }
 0x561   : > { %3621 = vpow2.f32 %v1446_v38  ;;  %v1443_v40 = vsub.f32 %v1373_v18, %v1435_v39 }
 0x563   : > { %v1448_v42 = vmul.f32 1.442695, %v1443_v40 }
 0x565   : > { %3623 = vpow2.f32 %v1448_v42 }
 0x56e   : > { %v3622_v43 = vpop.eup %3621 }
 0x56f   : > { %v1454_v45 = vsel %vm1185_vm2, %v3622_v43, 0.0 }
 0x570   : > { %1455 = vadd.xlane.f32.xlu0 %v1454_v45 }
 0x572   : > { %v3624_v32 = vpop.eup %3623  ;;  %v1438_v47 = vpop.xlane.xlu0 %1437 }
 0x573   : > { %v1444_v48 = vsub.f32 %v1423_v25, %v1438_v47  ;;  %v1457_v49 = vsel %vm1185_vm2, %v3624_v32, 0.0 }
 0x574   : > { %1458 = vadd.xlane.f32.xlu1 %v1457_v49 }
 0x575   : > { %v1450_v50 = vmul.f32 1.442695, %v1444_v48 }
 0x576   : > { %v1441_v55 = vpop.xlane.xlu0 %1440 }
 0x577   : > { %3625 = vpow2.f32 %v1450_v50  ;;  %v1445_v57 = vsub.f32 %v1426_v31, %v1441_v55 }
 0x579   : > { %v1452_v58 = vmul.f32 1.442695, %v1445_v57 }
 0x57b   : > { %3627 = vpow2.f32 %v1452_v58 }
 0x584   : > { %v3626_v53 = vpop.eup %3625 }
 0x585   : > { %1525 = vrot.lane.b32.xlu1 %v4495_v44, %s3983_s6  ;;  %v1460_v54 = vsel %vm1185_vm2, %v3626_v53, 0.0 }
 0x586   : > { %1461 = vadd.xlane.f32.xlu0 %v1460_v54 }
 0x588   : > { %v3628_v59 = vpop.eup %3627 }
 0x589   : > { %1595 = vrot.lane.b32.xlu1 %v4447_v41, %s3984_s12  ;;  %v1463_v60 = vsel %vm1185_vm2, %v3628_v59, 0.0 }
 0x59c   : > { %1477 = vrot.lane.b32.xlu0 %v4497_v46, %s3983_s6 }
 0x5a0   : > { %1593 = vrot.lane.b32.xlu0 %v4455_v51, %s3984_s12 }
 0x5ad   : > { %1464 = vadd.xlane.f32.xlu1 %v1463_v60 }
 0x5be   : > { %1646 = vrot.lane.b32.xlu1 %v4457_v52, %s3984_s12 }
 0x5c2   : > { %1644 = vrot.lane.b32.xlu1 %v4466_v56, %s3984_s12 }
 0x5f9   : > { %v1456_v62 = vpop.xlane.xlu0 %1455 }
 0x5fd   : > { %v1459_v61 = vpop.xlane.xlu1 %1458 }
 0x5fe   : > { %3629 = vrcp.f32 %v1459_v61 }
 0x5ff   : > { %3631 = vrcp.f32 %v1456_v62 }
 0x601   : > { %v1526_v63 = vpop.permute.xlu1 %1525 }
 0x602   : > { %3351 = vmatpush3.bf16.msra.mxu0 %v1526_v63 }
 0x603   : > { %3362 = vmatprep.subr.bf16.mxu0 %v3981_v27 }
 0x605   : > { %v1596_v7 = vpop.permute.xlu1 %1595 }
 0x606   : > { %v1601_v9 = vsel %vm1090_vm1, %v1596_v7, 0 }
 0x60b   : > { %v3630_v0 = vpop.eup %3629 }
 0x60c   : > { %v3632_v2 = vpop.eup %3631  ;;  %v1471_v3 = vmul.f32 %v3630_v0, %v3624_v32 }
 0x60d   : > { %v1470_v5 = vmul.f32 %v3632_v2, %v3622_v43 }
 0x60f   : > { %v1462_v1 = vpop.xlane.xlu0 %1461  ;;  %v1474_v8 = vpack.c.bf16 %v1471_v3, %v1470_v5 }
 0x610   : > { %3633 = vrcp.f32 %v1462_v1 }
 0x613   : > { %v1478_v4 = vpop.permute.xlu0 %1477 }
 0x614   : > { %3345 = vmatpush3.bf16.msra.mxu1 %v1478_v4 }
 0x615   : > { %3356 = vmatprep.subr.bf16.mxu1 %v3981_v27 }
 0x617   : > { %3347 = vmatmul.mubr.msk.bf16.vlgmr.msra.gmra.mxu1 %vm1185_vm2, %v1474_v8  ;;  %v1594_v10 = vpop.permute.xlu0 %1593 }
 0x618   : > { %3357 = vmatpush3.bf16.xpose.msra.mxu1 %v1601_v9  ;;  %3358 = vmatprep.mubr.msk.bf16.mxu1 %vm3982_vm0, %v3981_v27 }
 0x619   : > { %3368 = vmatprep.subr.bf16.mxu1 %v3981_v27 }
 0x61d   : > { %v3634_v12 = vpop.eup %3633 }
 0x61e   : > { %v1472_v14 = vmul.f32 %v3634_v12, %v3626_v53 }
 0x61f   : > { %3359 = vmatmul.mubr.msk.bf16.vlgmr.msra.gmra.mxu1 %vm1090_vm1, %v1594_v10 }
 0x620   : > { %3370 = vmatprep.mubr.msk.bf16.mxu1 %vm3982_vm0, %v3981_v27 }
 0x636   : > { %v1465_v11 = vpop.xlane.xlu1 %1464 }
 0x637   : > { %3635 = vrcp.f32 %v1465_v11 }
 0x63a   : > { %v1647_v16 = vpop.permute.xlu1 %1646 }
 0x63b   : > { %v1652_v18 = vsel %vm1090_vm1, %v1647_v16, 0 }
 0x63e   : > { %v1645_v19 = vpop.permute.xlu1 %1644 }
 0x644   : > { %v3636_v13 = vpop.eup %3635 }
 0x645   : > { %v1473_v15 = vmul.f32 %v3636_v13, %v3628_v59 }
 0x647   : > { %v1475_v17 = vpack.c.bf16 %v1473_v15, %v1472_v14 }
 0x649   : > { %3353 = vmatmul.mubr.msk.bf16.vlgmr.msra.gmra.mxu0 %vm1185_vm2, %v1475_v17 }
 0x64a   : > { %3363 = vmatpush3.bf16.xpose.msra.mxu0 %v1652_v18  ;;  %3364 = vmatprep.mubr.msk.bf16.mxu0 %vm3982_vm0, %v3981_v27 }
 0x64b   : > { %3374 = vmatprep.subr.bf16.mxu0 %v3981_v27 }
 0x651   : > { %3365 = vmatmul.mubr.msk.bf16.vlgmr.msra.gmra.mxu0 %vm1090_vm1, %v1645_v19 }
 0x652   : > { %3376 = vmatprep.mubr.msk.bf16.mxu0 %vm3982_vm0, %v3981_v27 }
 0x6d7   : > { %v4568_v20 = vpop.f32.mrf.mxu1 }
 0x6d9   : > { %v3348_v21 = vpop.f32.mrf.mxu1 }
 0x6db   : > { %v4570_v22 = vpop.f32.mrf.mxu1 }
 0x6dd   : > { %v3349_v23 = vpop.f32.mrf.mxu1 }
 0x6df   : > { %v1637_v24 = vpop.f32.mrf.mxu1 }
 0x6e0   : > { %v1695_v25 = vsel %vm1185_vm2, %v1637_v24, -inf }
 0x6e1   : > { %1696 = vmax.xlane.f32.xlu0 %v1695_v25  ;;  %v3360_v26 = vpop.f32.mrf.mxu1 }
 0x6e3   : > { %v1640_v28 = vpop.f32.mrf.mxu1 }
 0x6e4   : > { %v1698_v31 = vsel %vm1185_vm2, %v1640_v28, -inf }
 0x6e5   : > { %1699 = vmax.xlane.f32.xlu1 %v1698_v31  ;;  %v3361_v33 = vpop.f32.mrf.mxu1 }
 0x709   : > { %v4574_v34 = vpop.f32.mrf.mxu0 }
 0x70b   : > { %v3354_v35 = vpop.f32.mrf.mxu0 }
 0x70d   : > { %v4576_v36 = vpop.f32.mrf.mxu0 }
 0x70f   : > { %v3355_v38 = vpop.f32.mrf.mxu0 }
 0x711   : > { %v1688_v39 = vpop.f32.mrf.mxu0 }
 0x712   : > { %v1701_v40 = vsel %vm1185_vm2, %v1688_v39, -inf }
 0x713   : > { %1702 = vmax.xlane.f32.xlu0 %v1701_v40  ;;  %v3366_v42 = vpop.f32.mrf.mxu0 }
 0x715   : > { %v1691_v43 = vpop.f32.mrf.mxu0 }
 0x716   : > { %v1704_v45 = vsel %vm1185_vm2, %v1691_v43, -inf }
 0x717   : > { %1705 = vmax.xlane.f32.xlu0 %v1704_v45  ;;  %v3367_v32 = vpop.f32.mrf.mxu0 }
 0x76a   : > { %v1697_v47 = vpop.xlane.xlu0 %1696 }
 0x76b   : > { %v1707_v48 = vsub.f32 %v1637_v24, %v1697_v47 }
 0x76d   : > { %v1711_v49 = vmul.f32 1.442695, %v1707_v48 }
 0x76e   : > { %v1700_v50 = vpop.xlane.xlu1 %1699 }
 0x76f   : > { %3637 = vpow2.f32 %v1711_v49  ;;  %v1708_v53 = vsub.f32 %v1640_v28, %v1700_v50 }
 0x771   : > { %v1713_v54 = vmul.f32 1.442695, %v1708_v53 }
 0x773   : > { %3639 = vpow2.f32 %v1713_v54 }
 0x77c   : > { %v3638_v55 = vpop.eup %3637 }
 0x77d   : > { %v1719_v57 = vsel %vm1185_vm2, %v3638_v55, 0.0 }
 0x77e   : > { %1720 = vadd.xlane.f32.xlu0 %v1719_v57 }
 0x780   : > { %v3640_v58 = vpop.eup %3639 }
 0x781   : > { %v1722_v59 = vsel %vm1185_vm2, %v3640_v58, 0.0 }
 0x782   : > { %1723 = vadd.xlane.f32.xlu1 %v1722_v59 }
 0x793   : > { %1788 = vrot.lane.b32.xlu1 %v4495_v44, %s3984_s12 }
 0x797   : > { %1858 = vrot.lane.b32.xlu1 %v4447_v41, %s3985_s25 }
 0x79c   : > { %v1703_v60 = vpop.xlane.xlu0 %1702 }
 0x79d   : > { %v1709_v61 = vsub.f32 %v1688_v39, %v1703_v60 }
 0x79f   : > { %v1715_v62 = vmul.f32 1.442695, %v1709_v61 }
 0x7a0   : > { %v1706_v63 = vpop.xlane.xlu0 %1705 }
 0x7a1   : > { %3641 = vpow2.f32 %v1715_v62  ;;  %v1710_v0 = vsub.f32 %v1691_v43, %v1706_v63 }
 0x7a3   : > { %v1717_v1 = vmul.f32 1.442695, %v1710_v0 }
 0x7a5   : > { %3643 = vpow2.f32 %v1717_v1 }
 0x7ae   : > { %v3642_v2 = vpop.eup %3641 }
 0x7af   : > { %v1725_v3 = vsel %vm1185_vm2, %v3642_v2, 0.0 }
 0x7b0   : > { %1726 = vadd.xlane.f32.xlu0 %v1725_v3 }
 0x7b2   : > { %v3644_v4 = vpop.eup %3643 }
 0x7b3   : > { %v1728_v5 = vsel %vm1185_vm2, %v3644_v4, 0.0 }
 0x7bb   : > { %1729 = vadd.xlane.f32.xlu1 %v1728_v5 }
 0x7c6   : > { %1741 = vrot.lane.b32.xlu0 %v4497_v46, %s3984_s12 }
 0x7ca   : > { %1856 = vrot.lane.b32.xlu0 %v4455_v51, %s3985_s25 }
 0x7cc   : > { %1909 = vrot.lane.b32.xlu1 %v4457_v52, %s3985_s25 }
 0x7d0   : > { %1907 = vrot.lane.b32.xlu1 %v4466_v56, %s3985_s25 }
 0x807   : > { %v1721_v8 = vpop.xlane.xlu0 %1720 }
 0x80b   : > { %v1724_v41 = vpop.xlane.xlu1 %1723 }
 0x80c   : > { %3645 = vrcp.f32 %v1724_v41 }
 0x80d   : > { %3647 = vrcp.f32 %v1721_v8 }
 0x80f   : > { %v1789_v7 = vpop.permute.xlu1 %1788 }
 0x810   : > { %3375 = vmatpush3.bf16.msra.mxu0 %v1789_v7 }
 0x811   : > { %3386 = vmatprep.subr.bf16.mxu0 %v3981_v27 }
 0x813   : > { %v1859_v14 = vpop.permute.xlu1 %1858 }
 0x814   : > { %v1864_v56 = vsel %vm1090_vm1, %v1859_v14, 0 }
 0x819   : > { %v3646_v9 = vpop.eup %3645 }
 0x81a   : > { %v3648_v11 = vpop.eup %3647  ;;  %v1736_v12 = vmul.f32 %v3646_v9, %v3640_v58 }
 0x81b   : > { %v1735_v51 = vmul.f32 %v3648_v11, %v3638_v55 }
 0x81d   : > { %v1739_v52 = vpack.c.bf16 %v1736_v12, %v1735_v51 }
 0x839   : > { %v1727_v10 = vpop.xlane.xlu0 %1726 }
 0x83a   : > { %3649 = vrcp.f32 %v1727_v10 }
 0x83d   : > { %v1742_v13 = vpop.permute.xlu0 %1741 }
 0x83e   : > { %3369 = vmatpush3.bf16.msra.mxu1 %v1742_v13 }
 0x83f   : > { %3380 = vmatprep.subr.bf16.mxu1 %v3981_v27 }
 0x841   : > { %3371 = vmatmul.mubr.msk.bf16.vlgmr.msra.gmra.mxu1 %vm1185_vm2, %v1739_v52  ;;  %v1857_v16 = vpop.permute.xlu0 %1856 }
 0x842   : > { %3381 = vmatpush3.bf16.xpose.msra.mxu1 %v1864_v56  ;;  %3382 = vmatprep.mubr.msk.bf16.mxu1 %vm3982_vm0, %v3981_v27 }
 0x843   : > { %3392 = vmatprep.subr.bf16.mxu1 %v3981_v27 }
 0x844   : > { %v1730_v15 = vpop.xlane.xlu1 %1729 }
 0x845   : > { %3651 = vrcp.f32 %v1730_v15 }
 0x847   : > { %v3650_v17 = vpop.eup %3649 }
 0x848   : > { %v1737_v19 = vmul.f32 %v3650_v17, %v3642_v2  ;;  %v1910_v23 = vpop.permute.xlu1 %1909 }
 0x849   : > { %3383 = vmatmul.mubr.msk.bf16.vlgmr.msra.gmra.mxu1 %vm1090_vm1, %v1857_v16  ;;  %v1915_v25 = vsel %vm1090_vm1, %v1910_v23, 0 }
 0x84a   : > { %3394 = vmatprep.mubr.msk.bf16.mxu1 %vm3982_vm0, %v3981_v27 }
 0x84c   : > { %v1908_v26 = vpop.permute.xlu1 %1907 }
 0x852   : > { %v3652_v18 = vpop.eup %3651 }
 0x853   : > { %v1738_v21 = vmul.f32 %v3652_v18, %v3644_v4 }
 0x855   : > { %v1740_v24 = vpack.c.bf16 %v1738_v21, %v1737_v19 }
 0x857   : > { %3377 = vmatmul.mubr.msk.bf16.vlgmr.msra.gmra.mxu0 %vm1185_vm2, %v1740_v24 }
 0x858   : > { %3387 = vmatpush3.bf16.xpose.msra.mxu0 %v1915_v25  ;;  %3388 = vmatprep.mubr.msk.bf16.mxu0 %vm3982_vm0, %v3981_v27 }
 0x859   : > { %3398 = vmatprep.subr.bf16.mxu0 %v3981_v27 }
 0x85f   : > { %3389 = vmatmul.mubr.msk.bf16.vlgmr.msra.gmra.mxu0 %vm1090_vm1, %v1908_v26 }
 0x860   : > { %3400 = vmatprep.mubr.msk.bf16.mxu0 %vm3982_vm0, %v3981_v27 }
 0x901   : > { %v1781_v28 = vpop.f32.mrf.mxu1 }
 0x903   : > { %v3372_v31 = vpop.f32.mrf.mxu1 }
 0x905   : > { %v1784_v33 = vpop.f32.mrf.mxu1 }
 0x907   : > { %v3373_v35 = vpop.f32.mrf.mxu1 }
 0x909   : > { %v1900_v38 = vpop.f32.mrf.mxu1 }
 0x90a   : > { %v1958_v39 = vsel %vm1185_vm2, %v1900_v38, -inf }
 0x90b   : > { %1959 = vmax.xlane.f32.xlu0 %v1958_v39  ;;  %v3384_v40 = vpop.f32.mrf.mxu1  ;;  %v3558_v39 = vld [vmem:[%s4365_s0 + $0x30] sm:$0xff]  }
 0x90c   : > { %v3559_v40 = vld [vmem:[%s4365_s0 + $0x28] sm:$0xff]  }
 0x90d   : > { %v1903_v42 = vpop.f32.mrf.mxu1 }
 0x90e   : > { %v1961_v43 = vsel %vm1185_vm2, %v1903_v42, -inf }
 0x90f   : > { %1962 = vmax.xlane.f32.xlu1 %v1961_v43  ;;  %v3385_v45 = vpop.f32.mrf.mxu1  ;;  %v3561_v43 = vld [vmem:[%s4365_s0 + $0x18] sm:$0xff]  }
 0x917   : > { %v1828_v32 = vpop.f32.mrf.mxu0 }
 0x919   : > { %v3378_v47 = vpop.f32.mrf.mxu0 }
 0x91a   : > { %v3562_v47 = vld [vmem:[%s4365_s0 + $0x10] sm:$0xff]  }
 0x91b   : > { %v1831_v48 = vpop.f32.mrf.mxu0 }
 0x91d   : > { %v3379_v49 = vpop.f32.mrf.mxu0 }
 0x91f   : > { %v1951_v50 = vpop.f32.mrf.mxu0 }
 0x920   : > { %v1964_v27 = vsel %vm1185_vm2, %v1951_v50, -inf }
 0x921   : > { %1965 = vmax.xlane.f32.xlu0 %v1964_v27  ;;  %v3390_v53 = vpop.f32.mrf.mxu0  ;;  %v3564_v27 = vld [vmem:[%s4365_s0] sm:$0xff]  }
 0x923   : > { %v1954_v54 = vpop.f32.mrf.mxu0 }
 0x924   : > { %v1967_v55 = vsel %vm1185_vm2, %v1954_v54, -inf }
 0x925   : > { %1968 = vmax.xlane.f32.xlu0 %v1967_v55  ;;  %v3391_v57 = vpop.f32.mrf.mxu0 }
 0x994   : > { %v1960_v58 = vpop.xlane.xlu0 %1959 }
 0x995   : > { %v1970_v59 = vsub.f32 %v1900_v38, %v1960_v58  ;;  %v3557_v38 = vld [vmem:[%s4365_s0 + $0x38] sm:$0xff]  }
 0x997   : > { %v1974_v60 = vmul.f32 1.442695, %v1970_v59 }
 0x998   : > { %v1963_v61 = vpop.xlane.xlu1 %1962 }
 0x999   : > { %3653 = vpow2.f32 %v1974_v60  ;;  %v1971_v62 = vsub.f32 %v1903_v42, %v1963_v61  ;;  %v3560_v42 = vld [vmem:[%s4365_s0 + $0x20] sm:$0xff]  }
 0x99b   : > { %v1976_v63 = vmul.f32 1.442695, %v1971_v62 }
 0x99d   : > { %3655 = vpow2.f32 %v1976_v63 }
 0x9a6   : > { %v3654_v0 = vpop.eup %3653 }
 0x9a7   : > { %v1982_v1 = vsel %vm1185_vm2, %v3654_v0, 0.0 }
 0x9a8   : > { %1983 = vadd.xlane.f32.xlu0 %v1982_v1 }
 0x9aa   : > { %v3656_v2 = vpop.eup %3655  ;;  %v1966_v3 = vpop.xlane.xlu0 %1965 }
 0x9ab   : > { %v1972_v4 = vsub.f32 %v1951_v50, %v1966_v3  ;;  %v1985_v5 = vsel %vm1185_vm2, %v3656_v2, 0.0  ;;  %v3563_v50 = vld [vmem:[%s4365_s0 + $0x8] sm:$0xff]  }
 0x9ac   : > { %1986 = vadd.xlane.f32.xlu1 %v1985_v5  ;;  %v3133_v5 = vld [vmem:[%s4869_s7] ss:$0 sm:$0xff] }
 0x9ad   : > { %v1978_v41 = vmul.f32 1.442695, %v1972_v4 }
 0x9ae   : > { %v1969_v7 = vpop.xlane.xlu0 %1968 }
 0x9af   : > { %3657 = vpow2.f32 %v1978_v41  ;;  %v1973_v8 = vsub.f32 %v1954_v54, %v1969_v7 }
 0x9b1   : > { %v1980_v9 = vmul.f32 1.442695, %v1973_v8 }
 0x9b3   : > { %3659 = vpow2.f32 %v1980_v9 }
 0x9bc   : > { %v3658_v10 = vpop.eup %3657 }
 0x9bd   : > { %v1988_v11 = vsel %vm1185_vm2, %v3658_v10, 0.0 }
 0x9be   : > { %1989 = vadd.xlane.f32.xlu0 %v1988_v11 }
 0x9c0   : > { %v3660_v12 = vpop.eup %3659 }
 0x9c1   : > { %v1991_v13 = vsel %vm1185_vm2, %v3660_v12, 0.0 }
 0x9c2   : > { %1992 = vadd.xlane.f32.xlu1 %v1991_v13 }
 0x9d3   : > { %2051 = vrot.lane.b32.xlu1 %v4495_v44, %s3985_s25 }
 0x9d4   : > { %2004 = vrot.lane.b32.xlu0 %v4497_v46, %s3985_s25 }
 0x9d7   : > { %1576 = vrot.lane.b32.xlu1 %v4568_v20, %s3985_s25 }
 0x9d8   : > { %1580 = vrot.lane.b32.xlu0 %v4574_v34, %s3985_s25 }
 0x9db   : > { %1578 = vrot.lane.b32.xlu1 %v4570_v22, %s3985_s25 }
 0x9dc   : > { %1839 = vrot.lane.b32.xlu0 %v1781_v28, %s3984_s12 }
 0x9df   : > { %1582 = vrot.lane.b32.xlu1 %v4576_v36, %s3985_s25 }
 0x9e0   : > { %1843 = vrot.lane.b32.xlu0 %v1828_v32, %s3984_s12 }
 0x9e3   : > { %1841 = vrot.lane.b32.xlu1 %v1784_v33, %s3984_s12 }
 0x9e7   : > { %1845 = vrot.lane.b32.xlu1 %v1831_v48, %s3984_s12 }
 0xa31   : > { %v1984_v46 = vpop.xlane.xlu0 %1983 }
 0xa35   : > { %v1987_v44 = vpop.xlane.xlu1 %1986 }
 0xa36   : > { %3661 = vrcp.f32 %v1987_v44 }
 0xa37   : > { %3663 = vrcp.f32 %v1984_v46  ;;  %v3686_v46 = vld [vmem:[#allocation2] sm:$0xff] }
 0xa43   : > { %v3662_v20 = vpop.eup %3661 }
 0xa44   : > { %v3664_v51 = vpop.eup %3663  ;;  %v1999_v14 = vmul.f32 %v3662_v20, %v3656_v2 }
 0xa45   : > { %v1998_v56 = vmul.f32 %v3664_v51, %v3654_v0 }
 0xa47   : > { %v1990_v34 = vpop.xlane.xlu0 %1989  ;;  %v2002_v36 = vpack.c.bf16 %v1999_v14, %v1998_v56  ;;  %v3688_v14 = vld [vmem:[#allocation2 + $0x8] sm:$0xff]  ;;  %v3567_v56 = vld [vmem:[%s4373_s13 + $0x74] ss:$8 sps:$4 sm:$0xff]  }
 0xa48   : > { %3665 = vrcp.f32 %v1990_v34  ;;  %v3687_v34 = vld [vmem:[#allocation2 + $0x18] sm:$0xff] }
 0xa4b   : > { %v1993_v22 = vpop.xlane.xlu1 %1992  ;;  %v2005_v52 = vpop.permute.xlu0 %2004 }
 0xa4c   : > { %3667 = vrcp.f32 %v1993_v22  ;;  %3393 = vmatpush3.bf16.msra.mxu1 %v2005_v52  ;;  %v3565_v52 = vld [vmem:[%s4373_s13 + $0x70] ss:$8 sps:$4 sm:$0xff]  }
 0xa4d   : > { %3404 = vmatprep.subr.bf16.mxu1 %v3557_v38 }
 0xa4f   : > { %v2052_v15 = vpop.permute.xlu1 %2051  ;;  %3395 = vmatmul.mubr.msk.bf16.vlgmr.msra.gmra.mxu1 %vm1185_vm2, %v2002_v36  ;;  %v1581_v16 = vpop.permute.xlu0 %1580 }
 0xa50   : > { %1591 = vst.msk [vmem:[#allocation3 + $0x10] sm:$0xff] %vm1588_vm3, %v1581_v16  ;;  %3399 = vmatpush3.bf16.msra.mxu0 %v2052_v15  ;;  %3405 = vmatpush3.bf16.msra.mxu1 %v3557_v38 }
 0xa51   : > { %3406 = vmatprep.subr.bf16.mxu1 %v3558_v39  ;;  %2426 = vmatprep.subr.bf16.mxu0 %v3567_v56  ;;  %v3143_v56 = vld [vmem:[%s4870_s18] ss:$0 sm:$0xff] }
 0xa53   : > { %v1577_v17 = vpop.permute.xlu1 %1576  ;;  %v1840_v18 = vpop.permute.xlu0 %1839 }
 0xa54   : > { %1589 = vst.msk [vmem:[#allocation3] sm:$0xff] %vm1588_vm3, %v1577_v17  ;;  %3407 = vmatpush3.bf16.msra.mxu1 %v3558_v39  ;;  %v3570_v39 = vld [vmem:[%s4373_s13 + $0x64] ss:$8 sps:$4 sm:$0xff]  }
 0xa55   : > { %1852 = vst.msk [vmem:[#allocation3] sm:$0xff] %vm1851_vm4, %v1840_v18  ;;  %v3666_v19 = vpop.eup %3665  ;;  %3408 = vmatprep.subr.bf16.mxu1 %v3559_v40 }
 0xa56   : > { %v2000_v25 = vmul.f32 %v3666_v19, %v3658_v10  ;;  %v3685_v10 = vld [vmem:[#allocation2 + $0x10] sm:$0xff] }
 0xa57   : > { %v1579_v21 = vpop.permute.xlu1 %1578  ;;  %v1844_v23 = vpop.permute.xlu0 %1843 }
 0xa58   : > { %1590 = vst.msk [vmem:[#allocation3 + $0x8] sm:$0xff] %vm1588_vm3, %v1579_v21  ;;  %3409 = vmatpush3.bf16.msra.mxu1 %v3559_v40  ;;  %v3568_v40 = vld [vmem:[%s4373_s13 + $0x60] ss:$8 sps:$4 sm:$0xff]  }
 0xa59   : > { %1854 = vst.msk [vmem:[#allocation3 + $0x10] sm:$0xff] %vm1851_vm4, %v1844_v23  ;;  %v3668_v24 = vpop.eup %3667  ;;  %3410 = vmatprep.subr.bf16.mxu1 %v3560_v42 }
 0xa5a   : > { %v2001_v26 = vmul.f32 %v3668_v24, %v3660_v12 }
 0xa5b   : > { %v1583_v28 = vpop.permute.xlu1 %1582 }
 0xa5c   : > { %1592 = vst.msk [vmem:[#allocation3 + $0x18] sm:$0xff] %vm1588_vm3, %v1583_v28  ;;  %v2003_v31 = vpack.c.bf16 %v2001_v26, %v2000_v25  ;;  %3411 = vmatpush3.bf16.msra.mxu1 %v3560_v42  ;;  %v3573_v42 = vld [vmem:[%s4373_s13 + $0x54] ss:$8 sps:$4 sm:$0xff]  }
 0xa5d   : > { %3412 = vmatprep.subr.bf16.mxu1 %v3561_v43 }
 0xa5e   : > { %3401 = vmatmul.mubr.msk.bf16.vlgmr.msra.gmra.mxu0 %vm1185_vm2, %v2003_v31 }
 0xa5f   : > { %v1842_v33 = vpop.permute.xlu1 %1841  ;;  %2458 = vmatprep.mubr.bf16.mxu0 %v3980_v6  ;;  %2427 = vmatpush1.bf16.msra.mxu0 %v3565_v52 }
 0xa60   : > { %1853 = vst.msk [vmem:[#allocation3 + $0x8] sm:$0xff] %vm1851_vm4, %v1842_v33  ;;  %3413 = vmatpush3.bf16.msra.mxu1 %v3561_v43  ;;  %2428 = vmatprep.subr.bf16.mxu0 %v3570_v39  ;;  %v3571_v43 = vld [vmem:[%s4373_s13 + $0x50] ss:$8 sps:$4 sm:$0xff]   ;;  %v3603_v39 = vld [vmem:[%s4409_s17 + $0x40] sm:$0xff]  }
 0xa61   : > { %3414 = vmatprep.subr.bf16.mxu1 %v3562_v47 }
 0xa63   : > { %v1846_v35 = vpop.permute.xlu1 %1845  ;;  %2429 = vmatpush1.bf16.msra.mxu0 %v3568_v40  ;;  %v3604_v40 = vld [vmem:[%s4409_s17] sm:$0xff]  }
 0xa64   : > { %1855 = vst.msk [vmem:[#allocation3 + $0x18] sm:$0xff] %vm1851_vm4, %v1846_v35  ;;  %3415 = vmatpush3.bf16.msra.mxu1 %v3562_v47  ;;  %2430 = vmatprep.subr.bf16.mxu0 %v3573_v42  ;;  %v3577_v47 = vld [vmem:[%s4373_s13 + $0x30] ss:$8 sps:$4 sm:$0xff]  }
 0xa65   : > { %3416 = vmatprep.subr.bf16.mxu1 %v3563_v50 }
 0xa67   : > { %2431 = vmatpush1.bf16.msra.mxu0 %v3571_v43 }
 0xa68   : > { %3417 = vmatpush3.bf16.msra.mxu1 %v3563_v50  ;;  %v3580_v50 = vld [vmem:[%s4373_s13 + $0x20] ss:$8 sps:$4 sm:$0xff]  }
 0xa69   : > { %3418 = vmatprep.subr.bf16.mxu1 %v3564_v27 }
 0xa6c   : > { %3419 = vmatpush3.bf16.msra.mxu1 %v3564_v27  ;;  %v3585_v27 = vld [vmem:[%s4373_s13 + $0x14] ss:$8 sps:$4 sm:$0xff]  }
 0xb0f   : > { %v2044_v45 = vpop.f32.mrf.mxu1 }
 0xb10   : > { %2102 = vrot.lane.b32.xlu0 %v2044_v45, %s3983_s6  ;;  %v3576_v45 = vld [vmem:[%s4373_s13 + $0x44] ss:$8 sps:$4 sm:$0xff]  }
 0xb11   : > { %v3396_v32 = vpop.f32.mrf.mxu1  ;;  %2432 = vmatprep.subr.bf16.mxu0 %v3576_v45 }
 0xb12   : > { %v3574_v32 = vld [vmem:[%s4373_s13 + $0x40] ss:$8 sps:$4 sm:$0xff]  }
 0xb13   : > { %v2047_v48 = vpop.f32.mrf.mxu1  ;;  %2433 = vmatpush1.bf16.msra.mxu0 %v3574_v32 }
 0xb14   : > { %2104 = vrot.lane.b32.xlu1 %v2047_v48, %s3983_s6  ;;  %v3579_v48 = vld [vmem:[%s4373_s13 + $0x34] ss:$8 sps:$4 sm:$0xff]  }
 0xb15   : > { %v3397_v49 = vpop.f32.mrf.mxu1  ;;  %2434 = vmatprep.subr.bf16.mxu0 %v3579_v48 }
 0xb16   : > { %v3582_v49 = vld [vmem:[%s4373_s13 + $0x24] ss:$8 sps:$4 sm:$0xff]  }
 0xb17   : > { %2435 = vmatpush1.bf16.msra.mxu0 %v3577_v47 }
 0xb18   : > { %2436 = vmatprep.subr.bf16.mxu0 %v3582_v49 }
 0xb1b   : > { %2437 = vmatpush1.bf16.msra.mxu0 %v3580_v50 }
 0xb1c   : > { %2438 = vmatprep.subr.bf16.mxu0 %v3585_v27 }
 0xb1e   : > { %v2091_v53 = vpop.f32.mrf.mxu0 }
 0xb1f   : > { %2106 = vrot.lane.b32.xlu0 %v2091_v53, %s3983_s6  ;;  %v3583_v53 = vld [vmem:[%s4373_s13 + $0x10] ss:$8 sps:$4 sm:$0xff]  }
 0xb20   : > { %v3402_v54 = vpop.f32.mrf.mxu0  ;;  %2439 = vmatpush1.bf16.msra.mxu0 %v3583_v53 }
 0xb21   : > { %v3588_v54 = vld [vmem:[%s4373_s13 + $0x4] ss:$8 sps:$4 sm:$0xff]  }
 0xb22   : > { %v2094_v55 = vpop.f32.mrf.mxu0  ;;  %2440 = vmatprep.subr.bf16.mxu0 %v3588_v54 }
 0xb23   : > { %2108 = vrot.lane.b32.xlu1 %v2094_v55, %s3983_s6  ;;  %v3586_v55 = vld [vmem:[%s4373_s13] ss:$8 sps:$4 sm:$0xff]  }
 0xb24   : > { %v3403_v57 = vpop.f32.mrf.mxu0  ;;  %2441 = vmatpush1.bf16.msra.mxu0 %v3586_v55 }
 0xb25   : > { %v3589_v57 = vld [vmem:[%s4409_s17 + $0x78] sm:$0xff]  }
 0xb26   : > { %3260 = vmatprep.subr.bf16.mxu1 %v3589_v57 }
 0xb82   : > { %v2103_v58 = vpop.permute.xlu0 %2102 }
 0xb83   : > { %2115 = vst.msk [vmem:[#allocation3] sm:$0xff] %vm2114_vm5, %v2103_v58  ;;  %v3590_v58 = vld [vmem:[%s4409_s17 + $0x38] sm:$0xff]  }
 0xb86   : > { %v2105_v59 = vpop.permute.xlu1 %2104 }
 0xb87   : > { %2116 = vst.msk [vmem:[#allocation3 + $0x8] sm:$0xff] %vm2114_vm5, %v2105_v59  ;;  %v3591_v59 = vld [vmem:[%s4409_s17 + $0x70] sm:$0xff]  }
 0xb8a   : > { %v2119_v60 = vld [vmem:[#allocation3] sm:$0xff] }
 0xb8e   : > { %v2120_v61 = vld [vmem:[#allocation3 + $0x8] sm:$0xff] }
 0xb8f   : > { %v2123_v62 = vpack.c.bf16 %v2120_v61, %v2119_v60  ;;  %v3592_v60 = vld [vmem:[%s4409_s17 + $0x30] sm:$0xff]   ;;  %v3593_v61 = vld [vmem:[%s4409_s17 + $0x68] sm:$0xff]  }
 0xb91   : > { %3420 = vmatprep.mubr.bf16.mxu1 %v2123_v62  ;;  %v2107_v63 = vpop.permute.xlu0 %2106  ;;  %v3594_v62 = vld [vmem:[%s4409_s17 + $0x28] sm:$0xff]  }
 0xb92   : > { %2117 = vst.msk [vmem:[#allocation3 + $0x10] sm:$0xff] %vm2114_vm5, %v2107_v63  ;;  %v3595_v63 = vld [vmem:[%s4409_s17 + $0x60] sm:$0xff]  }
 0xb95   : > { %v2109_v0 = vpop.permute.xlu1 %2108 }
 0xb96   : > { %2118 = vst.msk [vmem:[#allocation3 + $0x18] sm:$0xff] %vm2114_vm5, %v2109_v0  ;;  %v3596_v0 = vld [vmem:[%s4409_s17 + $0x20] sm:$0xff]  }
 0xb99   : > { %v2121_v1 = vld [vmem:[#allocation3 + $0x10] sm:$0xff] }
 0xb9d   : > { %v2122_v2 = vld [vmem:[#allocation3 + $0x18] sm:$0xff] }
 0xb9e   : > { %v2124_v3 = vpack.c.bf16 %v2122_v2, %v2121_v1  ;;  %v3597_v1 = vld [vmem:[%s4409_s17 + $0x58] sm:$0xff]  }
 0xb9f   : > { %v3598_v2 = vld [vmem:[%s4409_s17 + $0x18] sm:$0xff]  }
 0xba0   : > { %3421 = vmatmul.mubr.bf16.vlgmr.msra.gmra.mxu1 %v2124_v3 }
 0xba1   : > { %3261 = vmatpush3.bf16.msra.mxu1 %v3590_v58 }
 0xba2   : > { %3262 = vmatprep.subr.bf16.mxu1 %v3591_v59 }
 0xba5   : > { %3263 = vmatpush3.bf16.msra.mxu1 %v3592_v60 }
 0xba6   : > { %3264 = vmatprep.subr.bf16.mxu1 %v3593_v61 }
 0xba9   : > { %3265 = vmatpush3.bf16.msra.mxu1 %v3594_v62 }
 0xbaa   : > { %3266 = vmatprep.subr.bf16.mxu1 %v3595_v63 }
 0xbad   : > { %3267 = vmatpush3.bf16.msra.mxu1 %v3596_v0 }
 0xbae   : > { %3268 = vmatprep.subr.bf16.mxu1 %v3597_v1 }
 0xbb1   : > { %3269 = vmatpush3.bf16.msra.mxu1 %v3598_v2 }
 0xc60   : > { %v3422_v4 = vpop.f32.mrf.mxu1 }
 0xc61   : > { %v2239_v9 = vadd.f32 %v3422_v4, %v3133_v5 }
 0xc62   : > { %v2230_v41 = vpop.f32.mrf.mxu1 }
 0xc63   : > { %v2231_v7 = vadd.f32 %v3133_v5, %v2230_v41  ;;  %v2247_v51 = vadd.f32 %v3687_v34, %v2239_v9  ;;  %v3142_v34 = vld [vmem:[%s772_s28] ss:$0 sm:$0xff] }
 0xc64   : > { %v3423_v8 = vpop.f32.mrf.mxu1 }
 0xc65   : > { %v2245_v11 = vadd.f32 %v3685_v10, %v2231_v7  ;;  %v2242_v44 = vadd.f32 %v3423_v8, %v3133_v5 }
 0xc66   : > { %v2233_v12 = vpop.f32.mrf.mxu1 }
 0xc67   : > { %v2234_v13 = vadd.f32 %v3133_v5, %v2233_v12  ;;  %2251 = vadd.xlane.f32.xlu0 %v2245_v11  ;;  %v2248_v22 = vadd.f32 %v3688_v14, %v2242_v44 }
 0xc69   : > { %v2246_v20 = vadd.f32 %v3686_v46, %v2234_v13 }
 0xc6b   : > { %2253 = vadd.xlane.f32.xlu1 %v2246_v20  ;;  %2255 = vadd.xlane.f32.xlu0 %v2247_v51 }
 0xc6f   : > { %2257 = vadd.xlane.f32.xlu0 %v2248_v22 }
 0xcf0   : > { %v2252_v36 = vpop.xlane.xlu0 %2251 }
 0xcf1   : > { %v2260_v15 = vmul.f32 0.0078125, %v2252_v36 }
 0xcf3   : > { %v4668_v16 = vsub.f32 %v2245_v11, %v2260_v15 }
 0xcf4   : > { %v2254_v17 = vpop.xlane.xlu1 %2253  ;;  %v2256_v18 = vpop.xlane.xlu0 %2255 }
 0xcf5   : > { %v2261_v19 = vmul.f32 0.0078125, %v2254_v17  ;;  %v2262_v21 = vmul.f32 0.0078125, %v2256_v18  ;;  %v2268_v23 = vmul.f32 %v4668_v16, %v4668_v16 }
 0xcf7   : > { %v4672_v24 = vsub.f32 %v2246_v20, %v2261_v19  ;;  %v4674_v25 = vsub.f32 %v2247_v51, %v2262_v21  ;;  %2272 = vadd.xlane.f32.xlu0 %v2268_v23 }
 0xcf8   : > { %v2258_v26 = vpop.xlane.xlu0 %2257 }
 0xcf9   : > { %v2263_v28 = vmul.f32 0.0078125, %v2258_v26  ;;  %v2269_v31 = vmul.f32 %v4672_v24, %v4672_v24  ;;  %v2270_v33 = vmul.f32 %v4674_v25, %v4674_v25 }
 0xcfb   : > { %v4680_v35 = vsub.f32 %v2248_v22, %v2263_v28  ;;  %2274 = vadd.xlane.f32.xlu1 %v2269_v31  ;;  %2276 = vadd.xlane.f32.xlu0 %v2270_v33  ;;  %v3599_v31 = vld [vmem:[%s4409_s17 + $0x50] sm:$0xff]  }
 0xcfc   : > { %v3600_v33 = vld [vmem:[%s4409_s17 + $0x10] sm:$0xff]   ;;  %3270 = vmatprep.subr.bf16.mxu1 %v3599_v31 }
 0xcfd   : > { %v2271_v38 = vmul.f32 %v4680_v35, %v4680_v35  ;;  %3271 = vmatpush3.bf16.msra.mxu1 %v3600_v33 }
 0xcff   : > { %2278 = vadd.xlane.f32.xlu1 %v2271_v38  ;;  %v3602_v38 = vld [vmem:[%s4409_s17 + $0x8] sm:$0xff]  }
 0xd80   : > { %v2273_v3 = vpop.xlane.xlu0 %2272 }
 0xd81   : > { %v2280_v4 = vmul.f32 0.0078125, %v2273_v3 }
 0xd83   : > { %v2284_v5 = vadd.f32 1e-05, %v2280_v4 }
 0xd84   : > { %v2275_v41 = vpop.xlane.xlu1 %2274  ;;  %v2277_v7 = vpop.xlane.xlu0 %2276 }
 0xd85   : > { %3669 = vrsqrt.f32 %v2284_v5  ;;  %v2281_v8 = vmul.f32 0.0078125, %v2275_v41  ;;  %v2282_v9 = vmul.f32 0.0078125, %v2277_v7 }
 0xd87   : > { %v2285_v10 = vadd.f32 1e-05, %v2281_v8  ;;  %v2286_v11 = vadd.f32 1e-05, %v2282_v9  ;;  %v3160_v9 = vld [vmem:[%s779_s15] ss:$0 sm:$0xff] }
 0xd88   : > { %v2279_v12 = vpop.xlane.xlu1 %2278 }
 0xd89   : > { %3671 = vrsqrt.f32 %v2285_v10  ;;  %v2283_v13 = vmul.f32 0.0078125, %v2279_v12 }
 0xd8a   : > { %3673 = vrsqrt.f32 %v2286_v11 }
 0xd8b   : > { %v2287_v44 = vadd.f32 1e-05, %v2283_v13 }
 0xd8d   : > { %3675 = vrsqrt.f32 %v2287_v44 }
 0xd92   : > { %v3670_v46 = vpop.eup %3669 }
 0xd93   : > { %v2292_v20 = vmul.f32 %v3670_v46, %v4668_v16 }
 0xd95   : > { %v2302_v22 = vmul.f32 %v3142_v34, %v2292_v20 }
 0xd96   : > { %v3672_v51 = vpop.eup %3671 }
 0xd97   : > { %v2293_v14 = vmul.f32 %v3672_v51, %v4672_v24  ;;  %v3674_v52 = vpop.eup %3673  ;;  %v4717_v17 = vadd.f32 %v3143_v56, %v2302_v22 }
 0xd98   : > { %v2294_v16 = vmul.f32 %v3674_v52, %v4674_v25 }
 0xd99   : > { %v2303_v36 = vmul.f32 %v3142_v34, %v2293_v14 }
 0xd9a   : > { %v3676_v15 = vpop.eup %3675  ;;  %v2304_v24 = vmul.f32 %v3142_v34, %v2294_v16 }
 0xd9b   : > { %v4719_v18 = vadd.f32 %v3143_v56, %v2303_v36  ;;  %v2295_v19 = vmul.f32 %v3676_v15, %v4680_v35  ;;  %v3601_v35 = vld [vmem:[%s4409_s17 + $0x48] sm:$0xff]  }
 0xd9c   : > { %v4728_v28 = vadd.f32 %v3143_v56, %v2304_v24  ;;  %3272 = vmatprep.subr.bf16.mxu1 %v3601_v35 }
 0xd9d   : > { %v2316_v21 = vpack.c.bf16 %v4719_v18, %v4717_v17  ;;  %v2305_v23 = vmul.f32 %v3142_v34, %v2295_v19  ;;  %3273 = vmatpush3.bf16.msra.mxu1 %v3602_v38 }
 0xd9e   : > { %3274 = vmatprep.subr.bf16.mxu1 %v3603_v39 }
 0xd9f   : > { %2459 = vmatmul.mubr.bf16.vlgmr.msra.gmra.mxu0 %v2316_v21  ;;  %v4726_v26 = vadd.f32 %v3143_v56, %v2305_v23 }
 0xda0   : > { %2468 = vmatprep.mubr.bf16.mxu0 %v3980_v6  ;;  %v2334_v6 = vld [vmem:[%s4399_s16] sm:$0x3] }
 0xda1   : > { %v2317_v25 = vpack.c.bf16 %v4726_v26, %v4728_v28  ;;  %3275 = vmatpush3.bf16.msra.mxu1 %v3604_v40  ;;  %v2343_v43 = vrot.slane %v2334_v6, %v845_v30  ;;  %v2339_v45 = vrot.slane %v2334_v6, %v841_v37 }
 0xda7   : > { %2469 = vmatmul.mubr.bf16.gmra.mxu0 %v2317_v25 }
 0xe5f   : > { %v2460_v42 = vpop.f32.mrf.mxu0 }
 0xe60   : > { %v2461_v50 = vadd.f32 %v2460_v42, %v2339_v45 }
 0xe61   : > { %v2462_v32 = vpop.f32.mrf.mxu0 }
 0xe62   : > { %v2463_v48 = vadd.f32 %v2462_v32, %v2343_v43  ;;  %v2479_v59 = vmax.f32 %v2461_v50, 0.0 }
 0xe63   : > { %v2464_v47 = vpop.f32.mrf.mxu0 }
 0xe64   : > { %v2465_v49 = vadd.f32 %v2464_v47, %v2339_v45  ;;  %v2480_v57 = vmax.f32 %v2463_v48, 0.0 }
 0xe65   : > { %v2466_v27 = vpop.f32.mrf.mxu0 }
 0xe66   : > { %v2467_v53 = vadd.f32 %v2466_v27, %v2343_v43  ;;  %v2481_v54 = vmax.f32 %v2465_v49, 0.0 }
 0xe67   : > { %v2470_v55 = vpop.f32.mrf.mxu0 }
 0xe68   : > { %v2482_v58 = vmax.f32 %v2467_v53, 0.0  ;;  %v2487_v62 = vpack.c.bf16 %v2481_v54, %v2479_v59  ;;  %v2471_v37 = vadd.f32 %v2470_v55, %v2339_v45 }
 0xe69   : > { %v2472_v60 = vpop.f32.mrf.mxu0 }
 0xe6a   : > { %v2488_v61 = vpack.c.bf16 %v2482_v58, %v2480_v57  ;;  %v2473_v30 = vadd.f32 %v2472_v60, %v2343_v43  ;;  %v2483_v5 = vmax.f32 %v2471_v37, 0.0 }
 0xe6b   : > { %v2474_v63 = vpop.f32.mrf.mxu0 }
 0xe6c   : > { %v2475_v29 = vadd.f32 %v2474_v63, %v2339_v45  ;;  %2658 = vmatprep.mubr.bf16.mxu1 %v2488_v61  ;;  %v2484_v3 = vmax.f32 %v2473_v30, 0.0  ;;  %v3177_v61 = vld [vmem:[%s782_s30] ss:$0 sm:$0xff] }
 0xe6d   : > { %v2476_v0 = vpop.f32.mrf.mxu0  ;;  %2659 = vmatmul.mubr.bf16.vlgmr.msra.gmra.mxu1 %v2487_v62  ;;  %v3178_v63 = vld [vmem:[%s785_s9] ss:$0 sm:$0xff] }
 0xe6e   : > { %v2477_v1 = vadd.f32 %v2476_v0, %v2343_v43  ;;  %v2485_v2 = vmax.f32 %v2475_v29, 0.0 }
 0xe70   : > { %v2486_v4 = vmax.f32 %v2477_v1, 0.0  ;;  %v2489_v7 = vpack.c.bf16 %v2485_v2, %v2483_v5 }
 0xe72   : > { %v2490_v41 = vpack.c.bf16 %v2486_v4, %v2484_v3 }
 0xe74   : > { %2666 = vmatprep.mubr.bf16.mxu1 %v2490_v41 }
 0xe75   : > { %2667 = vmatmul.mubr.bf16.gmra.mxu1 %v2489_v7 }
 0xf2d   : > { %v3276_v8 = vpop.f32.mrf.mxu1 }
 0xf2f   : > { %v3277_v10 = vpop.f32.mrf.mxu1 }
 0xf30   : > { %v3278_v11 = vadd.f32 %v3277_v10, %v3276_v8 }
 0xf31   : > { %v3279_v12 = vpop.f32.mrf.mxu1 }
 0xf32   : > { %v2661_v13 = vadd.f32 %v3278_v11, %v3160_v9 }
 0xf33   : > { %v3280_v44 = vpop.f32.mrf.mxu1 }
 0xf34   : > { %v3281_v46 = vadd.f32 %v3280_v44, %v3279_v12  ;;  %v2675_v20 = vadd.f32 %v2661_v13, %v4717_v17 }
 0xf35   : > { %v3282_v34 = vpop.f32.mrf.mxu1 }
 0xf36   : > { %v2664_v51 = vadd.f32 %v3281_v46, %v3160_v9  ;;  %2681 = vadd.xlane.f32.xlu0 %v2675_v20 }
 0xf37   : > { %v3283_v14 = vpop.f32.mrf.mxu1 }
 0xf38   : > { %v3284_v22 = vadd.f32 %v3283_v14, %v3282_v34  ;;  %v2676_v52 = vadd.f32 %v2664_v51, %v4719_v18 }
 0xf39   : > { %v3285_v56 = vpop.f32.mrf.mxu1 }
 0xf3a   : > { %v2669_v36 = vadd.f32 %v3284_v22, %v3160_v9  ;;  %2683 = vadd.xlane.f32.xlu1 %v2676_v52 }
 0xf3b   : > { %v3286_v15 = vpop.f32.mrf.mxu1 }
 0xf3c   : > { %v3287_v16 = vadd.f32 %v3286_v15, %v3285_v56  ;;  %v2677_v19 = vadd.f32 %v2669_v36, %v4728_v28 }
 0xf3e   : > { %v2672_v21 = vadd.f32 %v3287_v16, %v3160_v9  ;;  %2685 = vadd.xlane.f32.xlu0 %v2677_v19 }
 0xf40   : > { %v2678_v23 = vadd.f32 %v2672_v21, %v4726_v26 }
 0xf42   : > { %2687 = vadd.xlane.f32.xlu1 %v2678_v23 }
 0xfbf   : > { %v2682_v17 = vpop.xlane.xlu0 %2681 }
 0xfc0   : > { %v2689_v24 = vmul.f32 0.0078125, %v2682_v17 }
 0xfc2   : > { %v2693_v25 = vsub.f32 %v2675_v20, %v2689_v24 }
 0xfc3   : > { %v2684_v31 = vpop.xlane.xlu1 %2683 }
 0xfc4   : > { %v2690_v33 = vmul.f32 0.0078125, %v2684_v31  ;;  %v2697_v35 = vmul.f32 %v2693_v25, %v2693_v25 }
 0xfc6   : > { %v2694_v38 = vsub.f32 %v2676_v52, %v2690_v33  ;;  %2701 = vadd.xlane.f32.xlu0 %v2697_v35 }
 0xfc7   : > { %v2686_v18 = vpop.xlane.xlu0 %2685 }
 0xfc8   : > { %v2691_v39 = vmul.f32 0.0078125, %v2686_v18  ;;  %v2698_v40 = vmul.f32 %v2694_v38, %v2694_v38 }
 0xfca   : > { %v2695_v6 = vsub.f32 %v2677_v19, %v2691_v39  ;;  %2703 = vadd.xlane.f32.xlu1 %v2698_v40 }
 0xfcb   : > { %v2688_v42 = vpop.xlane.xlu1 %2687 }
 0xfcc   : > { %v2692_v28 = vmul.f32 0.0078125, %v2688_v42  ;;  %v2699_v43 = vmul.f32 %v2695_v6, %v2695_v6 }
 0xfce   : > { %v2696_v45 = vsub.f32 %v2678_v23, %v2692_v28  ;;  %2705 = vadd.xlane.f32.xlu0 %v2699_v43 }
 0xfd0   : > { %v2700_v26 = vmul.f32 %v2696_v45, %v2696_v45 }
 0xfd2   : > { %2707 = vadd.xlane.f32.xlu1 %v2700_v26 }
0x104f   : > { %v2702_v32 = vpop.xlane.xlu0 %2701 }
0x1050   : > { %v2709_v47 = vmul.f32 0.0078125, %v2702_v32 }
0x1052   : > { %v2713_v48 = vadd.f32 1e-05, %v2709_v47 }
0x1053   : > { %v2704_v49 = vpop.xlane.xlu1 %2703 }
0x1054   : > { %3677 = vrsqrt.f32 %v2713_v48  ;;  %v2710_v50 = vmul.f32 0.0078125, %v2704_v49 }
0x1056   : > { %v2714_v27 = vadd.f32 1e-05, %v2710_v50 }
0x1057   : > { %v2706_v53 = vpop.xlane.xlu0 %2705 }
0x1058   : > { %3679 = vrsqrt.f32 %v2714_v27  ;;  %v2711_v54 = vmul.f32 0.0078125, %v2706_v53 }
0x105a   : > { %v2715_v55 = vadd.f32 1e-05, %v2711_v54 }
0x105b   : > { %v2708_v57 = vpop.xlane.xlu1 %2707 }
0x105c   : > { %3681 = vrsqrt.f32 %v2715_v55  ;;  %v2712_v58 = vmul.f32 0.0078125, %v2708_v57 }
0x105e   : > { %v2716_v59 = vadd.f32 1e-05, %v2712_v58 }
0x1060   : > { %3683 = vrsqrt.f32 %v2716_v59 }
0x1061   : > { %v3678_v60 = vpop.eup %3677 }
0x1062   : > { %v2721_v62 = vmul.f32 %v3678_v60, %v2693_v25 }
0x1064   : > { %v2731_v30 = vmul.f32 %v3177_v61, %v2721_v62 }
0x1065   : > { %v3680_v29 = vpop.eup %3679 }
0x1066   : > { %v2741_v37 = vadd.f32 %v3178_v63, %v2731_v30  ;;  %v2722_v0 = vmul.f32 %v3680_v29, %v2694_v38 }
0x1068   : > { %2745 = vst [vmem:[#allocation2 + $0x10] sm:$0xff] %v2741_v37  ;;  %v2732_v1 = vmul.f32 %v3177_v61, %v2722_v0 }
0x1069   : > { %v3682_v2 = vpop.eup %3681 }
0x106a   : > { %v2742_v3 = vadd.f32 %v3178_v63, %v2732_v1  ;;  %v2723_v4 = vmul.f32 %v3682_v2, %v2695_v6 }
0x106c   : > { %2746 = vst [vmem:[#allocation2] sm:$0xff] %v2742_v3  ;;  %v2733_v5 = vmul.f32 %v3177_v61, %v2723_v4 }
0x106d   : > { %v3684_v41 = vpop.eup %3683 }
0x106e   : > { %v2743_v7 = vadd.f32 %v3178_v63, %v2733_v5  ;;  %v2724_v8 = vmul.f32 %v3684_v41, %v2696_v45 }
0x1070   : > { %2747 = vst [vmem:[#allocation2 + $0x18] sm:$0xff] %v2743_v7  ;;  %v2734_v9 = vmul.f32 %v3177_v61, %v2724_v8  ;;  %2752 = sbr.rel (%p3179_p9) target bundleno = 4530 (0x11b2), region = 116 }
0x1072   : > { %v2744_v10 = vadd.f32 %v3178_v63, %v2734_v9 }
0x1074   : > { %2748 = vst [vmem:[#allocation2 + $0x8] sm:$0xff] %v2744_v10 }
0x1075   : > { %2755 = vadd.xlane.f32.xlu0 %v2741_v37  ;;  %2759 = vadd.xlane.f32.xlu1 %v2743_v7  ;;  %v3180_v28 = vld [vmem:[%s4873_s3] ss:$0 sm:$0xff] }
0x1076   : > { %v3181_v47 = vld [vmem:[%s4874_s8] ss:$0 sm:$0xff] }
0x1079   : > { %2757 = vadd.xlane.f32.xlu0 %v2742_v3  ;;  %2761 = vadd.xlane.f32.xlu1 %v2744_v10 }
0x10fe   : > { %v2756_v11 = vpop.xlane.xlu0 %2755  ;;  %v2760_v12 = vpop.xlane.xlu1 %2759 }
0x10ff   : > { %v2763_v13 = vmul.f32 0.0078125, %v2756_v11  ;;  %v2765_v44 = vmul.f32 0.0078125, %v2760_v12 }
0x1101   : > { %v2767_v46 = vsub.f32 %v2741_v37, %v2763_v13  ;;  %v2769_v20 = vsub.f32 %v2743_v7, %v2765_v44 }
0x1102   : > { %v2758_v34 = vpop.xlane.xlu0 %2757  ;;  %v2762_v51 = vpop.xlane.xlu1 %2761 }
0x1103   : > { %v2764_v14 = vmul.f32 0.0078125, %v2758_v34  ;;  %v2771_v22 = vmul.f32 %v2767_v46, %v2767_v46  ;;  %v2766_v52 = vmul.f32 0.0078125, %v2762_v51  ;;  %v2773_v15 = vmul.f32 %v2769_v20, %v2769_v20 }
0x1105   : > { %v2768_v56 = vsub.f32 %v2742_v3, %v2764_v14  ;;  %2775 = vadd.xlane.f32.xlu0 %v2771_v22  ;;  %v2770_v36 = vsub.f32 %v2744_v10, %v2766_v52 }
0x1107   : > { %v2772_v16 = vmul.f32 %v2768_v56, %v2768_v56  ;;  %v2774_v19 = vmul.f32 %v2770_v36, %v2770_v36 }
0x1109   : > { %2779 = vadd.xlane.f32.xlu0 %v2773_v15  ;;  %2777 = vadd.xlane.f32.xlu1 %v2772_v16 }
0x110d   : > { %2781 = vadd.xlane.f32.xlu1 %v2774_v19 }
0x118e   : > { %v2776_v21 = vpop.xlane.xlu0 %2775 }
0x118f   : > { %v2783_v23 = vmul.f32 0.0078125, %v2776_v21 }
0x1191   : > { %v2787_v17 = vadd.f32 1e-05, %v2783_v23 }
0x1192   : > { %v2778_v24 = vpop.xlane.xlu1 %2777  ;;  %v2780_v25 = vpop.xlane.xlu0 %2779 }
0x1193   : > { %3689 = vrsqrt.f32 %v2787_v17  ;;  %v2784_v31 = vmul.f32 0.0078125, %v2778_v24  ;;  %v2785_v33 = vmul.f32 0.0078125, %v2780_v25 }
0x1195   : > { %v2788_v35 = vadd.f32 1e-05, %v2784_v31  ;;  %v2789_v38 = vadd.f32 1e-05, %v2785_v33 }
0x1196   : > { %v2782_v18 = vpop.xlane.xlu1 %2781 }
0x1197   : > { %3691 = vrsqrt.f32 %v2788_v35  ;;  %v2786_v39 = vmul.f32 0.0078125, %v2782_v18 }
0x1198   : > { %3693 = vrsqrt.f32 %v2789_v38 }
0x1199   : > { %v2790_v40 = vadd.f32 1e-05, %v2786_v39 }
0x119b   : > { %3695 = vrsqrt.f32 %v2790_v40 }
0x11a0   : > { %v3690_v6 = vpop.eup %3689 }
0x11a1   : > { %v2795_v42 = vmul.f32 %v3690_v6, %v2767_v46 }
0x11a3   : > { %v2805_v26 = vmul.f32 %v3180_v28, %v2795_v42 }
0x11a4   : > { %v3692_v43 = vpop.eup %3691 }
0x11a5   : > { %v3694_v45 = vpop.eup %3693  ;;  %v2796_v32 = vmul.f32 %v3692_v43, %v2768_v56  ;;  %v2815_v27 = vadd.f32 %v3181_v47, %v2805_v26 }
0x11a6   : > { %v2797_v48 = vmul.f32 %v3694_v45, %v2769_v20 }
0x11a7   : > { %v2806_v49 = vmul.f32 %v3180_v28, %v2796_v32 }
0x11a8   : > { %v3696_v50 = vpop.eup %3695  ;;  %v2807_v54 = vmul.f32 %v3180_v28, %v2797_v48 }
0x11a9   : > { %v2816_v53 = vadd.f32 %v3181_v47, %v2806_v49  ;;  %v2798_v55 = vmul.f32 %v3696_v50, %v2770_v36 }
0x11aa   : > { %v2817_v59 = vadd.f32 %v3181_v47, %v2807_v54 }
0x11ab   : > { %v3200_v57 = vpack.c.bf16 %v2816_v53, %v2815_v27  ;;  %v2808_v58 = vmul.f32 %v3180_v28, %v2798_v55 }
0x11ad   : > { %3201 = vst [vmem:[#allocation16] sm:$0xff] %v3200_v57   ;;  %v2818_v60 = vadd.f32 %v3181_v47, %v2808_v58 }
0x11af   : > { %v3205_v61 = vpack.c.bf16 %v2818_v60, %v2817_v59 }
0x11b1   : > { %3207 = vst [vmem:[#allocation16 + $0x8] sm:$0xff] %v3205_v61  }
0x11b2 PF: > { %p3476_p8 = scmp.eq.s32.totalorder %s4231_s22, 2  ;;  %s3986_s14 = smov [#allocation16]  }
0x11b3   : > { %s2845_s30 = sshll.u32 %s3986_s14, 4  ;;  %s2846_s30 = int_to_ptr.vmem [resolvable:$true] %s2845_s30 }
0x11b4   : > { %s3891_s17 = scalar_lea.vmem %s2846_s30, 256  ;;  %p3898_p4 = scmp.lt.s32.totalorder %s2846_s30, %s2846_s30 }
0x11b5   : > { %p3892_p10 = scmp.ne.s32.totalorder %s2846_s30, %s3891_s17  ;;  %p3899_p6 = scmp.lt.s32.totalorder %s3891_s17, %s3891_s17 }
0x11b7   : > { %p3893_p11 = pnand %p3892_p10, %p3476_p8  ;;  %p3900_p12 = por %p3899_p6, %p3898_p4 }
0x11b9   : > { %p3894_p0 = pneg %p3893_p11 }
0x11bb   : > { %p3901_p7 = pnand %p3900_p12, %p3894_p0 }
0x11bd   : > { %3904 = shalt.err (!%p3901_p7)
}
0x11be   : > { %s3987_s6 = smov 4   ;;  %s4875_s2 = sld [smem:[#allocation37_spill]] }
0x11c4   : > { %3447 = dma.vmem_to_hbm [thread:$0]  (%p3476_p8), %s2846_s30, 256, %s4875_s2, [#allocation6], %s3984_s12, %s3984_s12, %s3987_s6  }
0x11c5   : > { %3948 = dma.done.wait (%p3476_p8), [#allocation6], 256  }
0x11c6   : > { %3950 = vsyncadd (%p3476_p8), [#allocation6], 4294967040 }
0x11c7 PF: > { %s4876_s21 = sld [smem:[#allocation23_spill]]  ;;  %s4879_s18 = smov %s3957_s19 }
0x11c8   : > { %s4877_s7 = sld [smem:[#allocation22_spill]] }
0x11c9   : > { %s4878_s20 = sld [smem:[#allocation24_spill]] }
0x11cd   : > { %p33_p3 = scmp.ge.s32.totalorder %s4876_s21, 5  }
0x11ce   : > { %s4880_s19 = smov %s4877_s7 }
0x11cf   :  { %35 = sbr.rel (!%p33_p3) target bundleno = 23 (0x17), region = 207 }
0x11d4   :  { %2861 = vsyncpa [#allocation5], 1 }
0x11d5   :  { %2863 = vsyncpa [#allocation5 + $0x1], 1 }
0x11d6   :  { %2864 = vsyncpa [#allocation8], 1 }
0x11d7   :  { %2866 = vsyncpa [#allocation8 + $0x1], 1 }
0x11d8   :  { %2867 = vsyncpa [#allocation11], 1 }
0x11d9   :  { %2869 = vsyncpa [#allocation11 + $0x1], 1 }
0x11da   :  { %2870 = vsyncpa [#allocation14], 1 }
0x11db   :  { %2872 = vsyncpa [#allocation14 + $0x1], 1 }
0x11dc   :  { %2873 = vsyncpa [#allocation6], 1 }
0x11dd   :  { %2875 = vsyncpa [#allocation6 + $0x1], 1 }

</bundles_post_ra>
